<compile_context>
chip_gen: v7x
topology: tpu7x:2x2x1
jax: 0.10.0
libtpu: 0.0.40
codegen_flags: <defaults>
</compile_context>

<pallas_src>
import functools
import math

import jax
import jax.numpy as jnp
from jax.experimental import pallas as pl
from jax.experimental.pallas import tpu as pltpu


# --------------------------------- fused kernel ---------------------------------

def fused_abstractor_kernel(x_ref, s0_ref,
                            g1_ref, b1_ref, g2_ref, b2_ref,
                            sa_wqkv_ref, sa_wo_ref, sa_bo_ref,
                            ra_wqk_ref, ra_wv_ref, ra_wo_ref, ra_bo_ref,
                            w1_ref, bb1_ref, w2_ref, bb2_ref,
                            a_ref,
                            xhat_ref,
                            *, n_heads, compute_dtype):
    """One grid step = one batch block x one abstractor layer.

    a_ref (the output block) stays resident in VMEM across the layer axis and is
    the running symbol stream; xhat_ref caches the (layer-independent) normalized
    x for the relational attention queries/keys.
    """
    layer = pl.program_id(1)
    TB, S, D = a_ref.shape
    M = TB * S
    hd = D // n_heads
    cd = compute_dtype
    eps = 1e-5

    @pl.when(layer == 0)
    def _():
        # Symbol stream init: symbols + positional encoding, broadcast over batch.
        a_ref[...] = jnp.broadcast_to(s0_ref[...][None], (TB, S, D))
        # Cache layer-independent LayerNorm statistics of x (affine applied later).
        x2 = x_ref[...].reshape(M, D)
        mu = jnp.mean(x2, axis=-1, keepdims=True)
        var = jnp.mean((x2 - mu) ** 2, axis=-1, keepdims=True)
        xhat_ref[...] = ((x2 - mu) * jax.lax.rsqrt(var + eps)).reshape(TB, S, D)

    g1, b1 = g1_ref[0], b1_ref[0]            # (1, D) f32
    g2, b2 = g2_ref[0], b2_ref[0]

    def layernorm(v2d, g, b):
        # f32 statistics, biased variance -- matches torch.nn.LayerNorm.
        mu = jnp.mean(v2d, axis=-1, keepdims=True)
        var = jnp.mean((v2d - mu) ** 2, axis=-1, keepdims=True)
        return (v2d - mu) * jax.lax.rsqrt(var + eps) * g + b

    def attend(q2d, k2d, v2d, wo_ref, bo_ref):
        # q2d already carries the folded 1/sqrt(hd) scale (packed into Wq).
        q3 = q2d.reshape(TB, S, D)
        k3 = k2d.reshape(TB, S, D)
        v3 = v2d.reshape(TB, S, D)
        outs = []
        for h in range(n_heads):             # static head loop, batched over TB
            sl = slice(h * hd, (h + 1) * hd)
            sc = jnp.einsum("bqd,bkd->bqk",
                            q3[:, :, sl].astype(cd), k3[:, :, sl].astype(cd),
                            preferred_element_type=jnp.float32)
            sc = sc - jnp.max(sc, axis=-1, keepdims=True)
            e = jnp.exp(sc)
            p = e / jnp.sum(e, axis=-1, keepdims=True)      # exact softmax
            outs.append(jnp.einsum("bqk,bkd->bqd",
                                   p.astype(cd), v3[:, :, sl].astype(cd),
                                   preferred_element_type=jnp.float32))
        # One dense output-projection matmul over all heads (no masked stores).
        o = jnp.concatenate(outs, axis=-1).reshape(M, D).astype(cd)
        out = jnp.dot(o, wo_ref[0], preferred_element_type=jnp.float32) + bo_ref[0]
        return out.reshape(TB, S, D)

    x = x_ref[...]                            # (TB, S, D) f32, resident across layers
    a = a_ref[...]                            # (TB, S, D) f32 running symbol stream

    # ---- self-attention on the symbols (pre-norm, shared norm1), fused QKV ----
    an_c = layernorm(a.reshape(M, D), g1, b1).astype(cd)
    qkv = jnp.dot(an_c, sa_wqkv_ref[0], preferred_element_type=jnp.float32)   # (M, 3D)
    a = a + attend(qkv[:, :D], qkv[:, D:2 * D], qkv[:, 2 * D:],
                   sa_wo_ref, sa_bo_ref)

    # ---- relational cross-attention: q,k <- LN1(x) (cached stats), v <- a ----
    xn_c = (xhat_ref[...].reshape(M, D) * g1 + b1).astype(cd)
    qk = jnp.dot(xn_c, ra_wqk_ref[0], preferred_element_type=jnp.float32)     # (M, 2D)
    v = jnp.dot(a.reshape(M, D).astype(cd), ra_wv_ref[0],
                preferred_element_type=jnp.float32)                           # (M, D)
    a = x + attend(qk[:, :D], qk[:, D:], v, ra_wo_ref, ra_bo_ref)

    # ---- feed-forward block (pre-norm, residual) ----
    hn_c = layernorm(a.reshape(M, D), g2, b2).astype(cd)
    h = jnp.dot(hn_c, w1_ref[0], preferred_element_type=jnp.float32) + bb1_ref[0]
    h = jnp.maximum(h, 0.0)                   # activation='relu'
    y = jnp.dot(h.astype(cd), w2_ref[0], preferred_element_type=jnp.float32) + bb2_ref[0]
    a = a + y.reshape(TB, S, D)

    a_ref[...] = a


# ------------------------------ pallas_call wrapper ------------------------------

def _pick_tb(B, S, target_rows=512):
    """Batch-block size: TB*S rows ~ target_rows for MXU M-density / weight reuse,
    but capped so there are >= 2 batch blocks (keeps both v7x TCs busy)."""
    desired = max(1, -(-target_rows // S))
    cap = max(1, B // 2)
    tb = max(1, min(B, desired, cap))
    while B % tb:
        tb -= 1
    return tb


def pack_params(params, *, n_heads, compute_dtype=jnp.float32):
    """One-time host-side packing: fuse QKV projections, fold the attention scale
    into Wq, cast matmul weights to the compute dtype (do this ONCE, not per call)."""
    D = params["sa_wq"].shape[-1]
    hd = D // n_heads
    scale = 1.0 / math.sqrt(hd)
    wc = lambda w: w.astype(compute_dtype)
    return {
        "symbol_library": params["symbol_library"].astype(jnp.float32),
        "pos_enc": params["pos_enc"].astype(jnp.float32),
        "g1": params["g1"], "b1": params["b1"],
        "g2": params["g2"], "b2": params["b2"],
        "sa_wqkv": wc(jnp.concatenate(
            [params["sa_wq"] * scale, params["sa_wk"], params["sa_wv"]], axis=-1)),
        "sa_wo": wc(params["sa_wo"]), "sa_bo": params["sa_bo"],
        "ra_wqk": wc(jnp.concatenate(
            [params["ra_wq"] * scale, params["ra_wk"]], axis=-1)),
        "ra_wv": wc(params["ra_wv"]),
        "ra_wo": wc(params["ra_wo"]), "ra_bo": params["ra_bo"],
        "w1": wc(params["w1"]), "bb1": params["bb1"],
        "w2": wc(params["w2"]), "bb2": params["bb2"],
    }


def abstractor_forward(x, packed, *, n_heads, compute_dtype=jnp.float32,
                       vmem_limit_bytes=64 * 1024 * 1024):
    # vmem_limit_bytes: raise to ~100 MiB on v5e/v6e for big tiles; keep ~48-56 MiB
    # headroom-wise on v7x (64 MiB physical) at production sizes.
    B, S, D = x.shape
    L = packed["sa_wqkv"].shape[0]
    tb = _pick_tb(B, S)

    # PositionalSymbolRetriever + sinusoidal positional encoding (tiny; host side).
    s0 = (packed["symbol_library"][:S] + packed["pos_enc"][:S]).astype(jnp.float32)

    seq_spec = pl.BlockSpec((tb, S, D), lambda i, l: (i, 0, 0))      # resident over l
    s0_spec = pl.BlockSpec((S, D), lambda i, l: (0, 0))              # resident over i,l

    def wspec(arr):                           # per-layer stacked param block
        return pl.BlockSpec((1,) + arr.shape[1:],
                            lambda i, l: (l,) + (0,) * (arr.ndim - 1))

    inputs = [
        x.astype(jnp.float32), s0,
        packed["g1"], packed["b1"], packed["g2"], packed["b2"],
        packed["sa_wqkv"], packed["sa_wo"], packed["sa_bo"],
        packed["ra_wqk"], packed["ra_wv"], packed["ra_wo"], packed["ra_bo"],
        packed["w1"], packed["bb1"], packed["w2"], packed["bb2"],
    ]
    in_specs = [seq_spec, s0_spec] + [wspec(a) for a in inputs[2:]]

    kernel = functools.partial(fused_abstractor_kernel,
                               n_heads=n_heads, compute_dtype=compute_dtype)

    return pl.pallas_call(
        kernel,
        out_shape=jax.ShapeDtypeStruct((B, S, D), jnp.float32),
        grid=(B // tb, L),
        in_specs=in_specs,
        out_specs=seq_spec,
        scratch_shapes=[pltpu.VMEM((tb, S, D), jnp.float32)],   # cached LN(x) stats
        compiler_params=pltpu.CompilerParams(
            dimension_semantics=("parallel", "arbitrary"),
            vmem_limit_bytes=vmem_limit_bytes),
    )(*inputs)


# ---------------------------- plain-JAX reference check ----------------------------

def reference_forward(x, params, *, n_heads, compute_dtype=jnp.float32):
    cd = compute_dtype
    hp = jax.lax.Precision.HIGHEST            # accurate f32 oracle on real TPUs

    def dot(a, b):
        return jnp.dot(a.astype(cd), b.astype(cd),
                       preferred_element_type=jnp.float32, precision=hp)

    def ln(v, g, b, eps=1e-5):
        mu = jnp.mean(v, axis=-1, keepdims=True)
        var = jnp.mean((v - mu) ** 2, axis=-1, keepdims=True)
        return (v - mu) * jax.lax.rsqrt(var + eps) * g + b

    def mha(xn, v_in, wq, wk, wv, wo, bo):
        B, S, D = xn.shape
        hd = D // n_heads
        q = dot(xn, wq).reshape(B, S, n_heads, hd).astype(cd)
        k = dot(xn, wk).reshape(B, S, n_heads, hd).astype(cd)
        v = dot(v_in, wv).reshape(B, S, n_heads, hd).astype(cd)
        sc = jnp.einsum("bqhd,bkhd->bhqk", q, k, precision=hp,
                        preferred_element_type=jnp.float32) * (1.0 / math.sqrt(hd))
        p = jax.nn.softmax(sc, axis=-1)
        o = jnp.einsum("bhqk,bkhd->bqhd", p.astype(cd), v, precision=hp,
                       preferred_element_type=jnp.float32).reshape(B, S, D)
        return dot(o, wo) + bo

    B, S, D = x.shape
    s = jnp.broadcast_to((params["symbol_library"][:S] + params["pos_enc"][:S])[None],
                         (B, S, D))
    a = s
    L = params["sa_wq"].shape[0]
    for l in range(L):
        g1, b1 = params["g1"][l], params["b1"][l]
        g2, b2 = params["g2"][l], params["b2"][l]
        a_ = ln(a, g1, b1)
        a = a + mha(a_, a_, params["sa_wq"][l], params["sa_wk"][l],
                    params["sa_wv"][l], params["sa_wo"][l], params["sa_bo"][l])
        x_ = ln(x, g1, b1)
        a = x + mha(x_, a, params["ra_wq"][l], params["ra_wk"][l],
                    params["ra_wv"][l], params["ra_wo"][l], params["ra_bo"][l])
        h_ = ln(a, g2, b2)
        hid = jnp.maximum(dot(h_, params["w1"][l]) + params["bb1"][l], 0.0)
        a = a + dot(hid, params["w2"][l]) + params["bb2"][l]
    return a


# ------------------------------------ param init ------------------------------------

def make_params(key, *, n_layers, d_model, dff, max_len):
    D, L = d_model, n_layers
    ks = jax.random.split(key, 16)
    sc = 1.0 / math.sqrt(D)

    pos = jnp.arange(max_len, dtype=jnp.float32)[:, None]
    div = jnp.exp(jnp.arange(0, D, 2, dtype=jnp.float32) * (-math.log(10000.0) / D))
    pe = jnp.zeros((max_len, D), jnp.float32)
    pe = pe.at[:, 0::2].set(jnp.sin(pos * div))
    pe = pe.at[:, 1::2].set(jnp.cos(pos * div))

    nrm = lambda k, shape, s: jax.random.normal(k, shape, jnp.float32) * s
    return {
        "symbol_library": nrm(ks[0], (max_len, D), 1.0),
        "pos_enc": pe,
        "g1": jnp.ones((L, 1, D), jnp.float32),
        "b1": jnp.zeros((L, 1, D), jnp.float32),
        "g2": jnp.ones((L, 1, D), jnp.float32),
        "b2": jnp.zeros((L, 1, D), jnp.float32),
        # self-attention (no q/k/v bias assumed; output bias used)
        "sa_wq": nrm(ks[1], (L, D, D), sc), "sa_wk": nrm(ks[2], (L, D, D), sc),
        "sa_wv": nrm(ks[3], (L, D, D), sc), "sa_wo": nrm(ks[4], (L, D, D), sc),
        "sa_bo": nrm(ks[5], (L, 1, D), 0.02),
        # relational cross-attention
        "ra_wq": nrm(ks[6], (L, D, D), sc), "ra_wk": nrm(ks[7], (L, D, D), sc),
        "ra_wv": nrm(ks[8], (L, D, D), sc), "ra_wo": nrm(ks[9], (L, D, D), sc),
        "ra_bo": nrm(ks[10], (L, 1, D), 0.02),
        # feed-forward block
        "w1": nrm(ks[11], (L, D, dff), sc), "bb1": nrm(ks[12], (L, 1, dff), 0.02),
        "w2": nrm(ks[13], (L, dff, D), 1.0 / math.sqrt(dff)),
        "bb2": nrm(ks[14], (L, 1, D), 0.02),
    }


# --------------------------------------- main ---------------------------------------

if __name__ == "__main__":
    B, S, D, H, DFF = 2, 8, 32, 4, 64
    N_LAYERS, MAX_LEN = 2, 16

    key = jax.random.PRNGKey(0)
    kx, kp = jax.random.split(key)
    x = jax.random.normal(kx, (B, S, D), jnp.float32)
    params = make_params(kp, n_layers=N_LAYERS, d_model=D, dff=DFF, max_len=MAX_LEN)

    # f32 matmul path (tolerance covers MXU pass-precision differences across chips).
    packed32 = pack_params(params, n_heads=H, compute_dtype=jnp.float32)
    out32 = jax.block_until_ready(
        abstractor_forward(x, packed32, n_heads=H, compute_dtype=jnp.float32))
    ref32 = jax.block_until_ready(
        reference_forward(x, params, n_heads=H, compute_dtype=jnp.float32))
    assert out32.shape == (B, S, D)
    assert bool(jnp.all(jnp.isfinite(out32)))
    err32 = float(jnp.max(jnp.abs(out32 - ref32)))
    assert jnp.allclose(out32, ref32, atol=2e-2, rtol=2e-2), err32

    # bf16 matmul path (recommended on v5e/v6e/v7x): checked against a reference
    # doing the same bf16-input / f32-accumulate matmuls.
    packed16 = pack_params(params, n_heads=H, compute_dtype=jnp.bfloat16)
    out16 = jax.block_until_ready(
        abstractor_forward(x, packed16, n_heads=H, compute_dtype=jnp.bfloat16))
    ref16 = jax.block_until_ready(
        reference_forward(x, params, n_heads=H, compute_dtype=jnp.bfloat16))
    assert bool(jnp.all(jnp.isfinite(out16)))
    err16 = float(jnp.max(jnp.abs(out16 - ref16)))
    assert jnp.allclose(out16, ref16, atol=6e-2, rtol=6e-2), err16

    print("KERNEL_OK")
</pallas_src>

<mosaic_0001>
module attributes {stable_mosaic.version = 11 : i64} {
  func.func @fused_abstractor_kernel(%arg0: i32, %arg1: i32, %arg2: memref<1x8x32xf32, #tpu.memory_space<vmem>>, %arg3: memref<8x32xf32, #tpu.memory_space<vmem>>, %arg4: memref<1x1x32xf32, #tpu.memory_space<vmem>>, %arg5: memref<1x1x32xf32, #tpu.memory_space<vmem>>, %arg6: memref<1x1x32xf32, #tpu.memory_space<vmem>>, %arg7: memref<1x1x32xf32, #tpu.memory_space<vmem>>, %arg8: memref<1x32x96xf32, #tpu.memory_space<vmem>>, %arg9: memref<1x32x32xf32, #tpu.memory_space<vmem>>, %arg10: memref<1x1x32xf32, #tpu.memory_space<vmem>>, %arg11: memref<1x32x64xf32, #tpu.memory_space<vmem>>, %arg12: memref<1x32x32xf32, #tpu.memory_space<vmem>>, %arg13: memref<1x32x32xf32, #tpu.memory_space<vmem>>, %arg14: memref<1x1x32xf32, #tpu.memory_space<vmem>>, %arg15: memref<1x32x64xf32, #tpu.memory_space<vmem>>, %arg16: memref<1x1x64xf32, #tpu.memory_space<vmem>>, %arg17: memref<1x64x32xf32, #tpu.memory_space<vmem>>, %arg18: memref<1x1x32xf32, #tpu.memory_space<vmem>>, %arg19: memref<1x8x32xf32, #tpu.memory_space<vmem>>, %arg20: memref<1x8x32xf32, #tpu.memory_space<vmem>>) attributes {dimension_semantics = [#tpu.dimension_semantics<parallel>, #tpu.dimension_semantics<arbitrary>], iteration_bounds = array<i64: 2, 2>, scalar_prefetch = 0 : i64, scratch_operands = 1 : i64, tpu.core_type = #tpu.core_type<tc>, window_params = [{transform_indices = @transform_0, window_bounds = array<i64: 1, 8, 32>}, {pipeline_mode = #tpu.pipeline_mode<synchronous>, transform_indices = @transform_1, window_bounds = array<i64: 8, 32>}, {transform_indices = @transform_2, window_bounds = array<i64: 1, 1, 32>}, {transform_indices = @transform_3, window_bounds = array<i64: 1, 1, 32>}, {transform_indices = @transform_4, window_bounds = array<i64: 1, 1, 32>}, {transform_indices = @transform_5, window_bounds = array<i64: 1, 1, 32>}, {transform_indices = @transform_6, window_bounds = array<i64: 1, 32, 96>}, {transform_indices = @transform_7, window_bounds = array<i64: 1, 32, 32>}, {transform_indices = @transform_8, window_bounds = array<i64: 1, 1, 32>}, {transform_indices = @transform_9, window_bounds = array<i64: 1, 32, 64>}, {transform_indices = @transform_10, window_bounds = array<i64: 1, 32, 32>}, {transform_indices = @transform_11, window_bounds = array<i64: 1, 32, 32>}, {transform_indices = @transform_12, window_bounds = array<i64: 1, 1, 32>}, {transform_indices = @transform_13, window_bounds = array<i64: 1, 32, 64>}, {transform_indices = @transform_14, window_bounds = array<i64: 1, 1, 64>}, {transform_indices = @transform_15, window_bounds = array<i64: 1, 64, 32>}, {transform_indices = @transform_16, window_bounds = array<i64: 1, 1, 32>}, {transform_indices = @transform_17, window_bounds = array<i64: 1, 8, 32>}]} {
    %c0_i32 = arith.constant 0 : i32
    %0 = arith.cmpi eq, %arg1, %c0_i32 : i32
    %1 = arith.extui %0 : i1 to i32
    %c0_i32_0 = arith.constant 0 : i32
    %2 = arith.cmpi ne, %1, %c0_i32_0 : i32
    scf.if %2 {
      %c0_106 = arith.constant 0 : index
      %c0_107 = arith.constant 0 : index
      %239 = vector.load %arg3[%c0_106, %c0_107] : memref<8x32xf32, #tpu.memory_space<vmem>>, vector<8x32xf32>
      %240 = vector.shape_cast %239 : vector<8x32xf32> to vector<1x8x32xf32>
      %c0_108 = arith.constant 0 : index
      %c0_109 = arith.constant 0 : index
      %c0_110 = arith.constant 0 : index
      %241 = vector.load %arg19[%c0_108, %c0_109, %c0_110] : memref<1x8x32xf32, #tpu.memory_space<vmem>>, vector<1x8x32xf32>
      tpu.vector_store %arg19[%c0_108, %c0_109, %c0_110], %240 {strides = array<i32>} : memref<1x8x32xf32, #tpu.memory_space<vmem>>, vector<1x8x32xf32>,
      %c0_111 = arith.constant 0 : index
      %c0_112 = arith.constant 0 : index
      %c0_113 = arith.constant 0 : index
      %242 = vector.load %arg2[%c0_111, %c0_112, %c0_113] : memref<1x8x32xf32, #tpu.memory_space<vmem>>, vector<1x8x32xf32>
      %243 = vector.shape_cast %242 : vector<1x8x32xf32> to vector<8x32xf32>
      %cst_114 = arith.constant dense<0.000000e+00> : vector<8xf32>
      %244 = vector.multi_reduction <add>, %243, %cst_114 [1] : vector<8x32xf32> to vector<8xf32>
      %245 = vector.shape_cast %244 : vector<8xf32> to vector<8x1xf32>
      %cst_115 = arith.constant 3.200000e+01 : f32
      %246 = vector.broadcast %cst_115 : f32 to vector<8x1xf32>
      %247 = arith.divf %245, %246 : vector<8x1xf32>
      %248 = vector.broadcast %247 : vector<8x1xf32> to vector<8x32xf32>
      %249 = arith.subf %243, %248 : vector<8x32xf32>
      %250 = arith.mulf %249, %249 : vector<8x32xf32>
      %cst_116 = arith.constant dense<0.000000e+00> : vector<8xf32>
      %251 = vector.multi_reduction <add>, %250, %cst_116 [1] : vector<8x32xf32> to vector<8xf32>
      %252 = vector.shape_cast %251 : vector<8xf32> to vector<8x1xf32>
      %cst_117 = arith.constant 3.200000e+01 : f32
      %253 = vector.broadcast %cst_117 : f32 to vector<8x1xf32>
      %254 = arith.divf %252, %253 : vector<8x1xf32>
      %255 = vector.broadcast %247 : vector<8x1xf32> to vector<8x32xf32>
      %256 = arith.subf %243, %255 : vector<8x32xf32>
      %cst_118 = arith.constant 9.99999974E-6 : f32
      %257 = vector.broadcast %cst_118 : f32 to vector<8x1xf32>
      %258 = arith.addf %254, %257 : vector<8x1xf32>
      %259 = math.rsqrt %258 : vector<8x1xf32>
      %260 = vector.broadcast %259 : vector<8x1xf32> to vector<8x32xf32>
      %261 = arith.mulf %256, %260 : vector<8x32xf32>
      %262 = vector.shape_cast %261 : vector<8x32xf32> to vector<1x8x32xf32>
      %c0_119 = arith.constant 0 : index
      %c0_120 = arith.constant 0 : index
      %c0_121 = arith.constant 0 : index
      %263 = vector.load %arg20[%c0_119, %c0_120, %c0_121] : memref<1x8x32xf32, #tpu.memory_space<vmem>>, vector<1x8x32xf32>
      tpu.vector_store %arg20[%c0_119, %c0_120, %c0_121], %262 {strides = array<i32>} : memref<1x8x32xf32, #tpu.memory_space<vmem>>, vector<1x8x32xf32>,
    } else {
    }
    %c0 = arith.constant 0 : index
    %c0_1 = arith.constant 0 : index
    %c0_2 = arith.constant 0 : index
    %3 = vector.load %arg4[%c0, %c0_1, %c0_2] : memref<1x1x32xf32, #tpu.memory_space<vmem>>, vector<1x1x32xf32>
    %4 = vector.shape_cast %3 : vector<1x1x32xf32> to vector<1x32xf32>
    %c0_3 = arith.constant 0 : index
    %c0_4 = arith.constant 0 : index
    %c0_5 = arith.constant 0 : index
    %5 = vector.load %arg5[%c0_3, %c0_4, %c0_5] : memref<1x1x32xf32, #tpu.memory_space<vmem>>, vector<1x1x32xf32>
    %6 = vector.shape_cast %5 : vector<1x1x32xf32> to vector<1x32xf32>
    %c0_6 = arith.constant 0 : index
    %c0_7 = arith.constant 0 : index
    %c0_8 = arith.constant 0 : index
    %7 = vector.load %arg6[%c0_6, %c0_7, %c0_8] : memref<1x1x32xf32, #tpu.memory_space<vmem>>, vector<1x1x32xf32>
    %8 = vector.shape_cast %7 : vector<1x1x32xf32> to vector<1x32xf32>
    %c0_9 = arith.constant 0 : index
    %c0_10 = arith.constant 0 : index
    %c0_11 = arith.constant 0 : index
    %9 = vector.load %arg7[%c0_9, %c0_10, %c0_11] : memref<1x1x32xf32, #tpu.memory_space<vmem>>, vector<1x1x32xf32>
    %10 = vector.shape_cast %9 : vector<1x1x32xf32> to vector<1x32xf32>
    %c0_12 = arith.constant 0 : index
    %c0_13 = arith.constant 0 : index
    %c0_14 = arith.constant 0 : index
    %11 = vector.load %arg2[%c0_12, %c0_13, %c0_14] : memref<1x8x32xf32, #tpu.memory_space<vmem>>, vector<1x8x32xf32>
    %c0_15 = arith.constant 0 : index
    %c0_16 = arith.constant 0 : index
    %c0_17 = arith.constant 0 : index
    %12 = vector.load %arg19[%c0_15, %c0_16, %c0_17] : memref<1x8x32xf32, #tpu.memory_space<vmem>>, vector<1x8x32xf32>
    %13 = vector.shape_cast %12 : vector<1x8x32xf32> to vector<8x32xf32>
    %cst = arith.constant dense<0.000000e+00> : vector<8xf32>
    %14 = vector.multi_reduction <add>, %13, %cst [1] : vector<8x32xf32> to vector<8xf32>
    %15 = vector.shape_cast %14 : vector<8xf32> to vector<8x1xf32>
    %cst_18 = arith.constant 3.200000e+01 : f32
    %16 = vector.broadcast %cst_18 : f32 to vector<8x1xf32>
    %17 = arith.divf %15, %16 : vector<8x1xf32>
    %18 = vector.broadcast %17 : vector<8x1xf32> to vector<8x32xf32>
    %19 = arith.subf %13, %18 : vector<8x32xf32>
    %20 = arith.mulf %19, %19 : vector<8x32xf32>
    %cst_19 = arith.constant dense<0.000000e+00> : vector<8xf32>
    %21 = vector.multi_reduction <add>, %20, %cst_19 [1] : vector<8x32xf32> to vector<8xf32>
    %22 = vector.shape_cast %21 : vector<8xf32> to vector<8x1xf32>
    %cst_20 = arith.constant 3.200000e+01 : f32
    %23 = vector.broadcast %cst_20 : f32 to vector<8x1xf32>
    %24 = arith.divf %22, %23 : vector<8x1xf32>
    %25 = vector.broadcast %17 : vector<8x1xf32> to vector<8x32xf32>
    %26 = arith.subf %13, %25 : vector<8x32xf32>
    %cst_21 = arith.constant 9.99999974E-6 : f32
    %27 = vector.broadcast %cst_21 : f32 to vector<8x1xf32>
    %28 = arith.addf %24, %27 : vector<8x1xf32>
    %29 = math.rsqrt %28 : vector<8x1xf32>
    %30 = vector.broadcast %29 : vector<8x1xf32> to vector<8x32xf32>
    %31 = arith.mulf %26, %30 : vector<8x32xf32>
    %32 = vector.broadcast %4 : vector<1x32xf32> to vector<8x32xf32>
    %33 = arith.mulf %31, %32 : vector<8x32xf32>
    %34 = vector.broadcast %6 : vector<1x32xf32> to vector<8x32xf32>
    %35 = arith.addf %33, %34 : vector<8x32xf32>
    %c0_22 = arith.constant 0 : index
    %c0_23 = arith.constant 0 : index
    %c0_24 = arith.constant 0 : index
    %36 = vector.load %arg8[%c0_22, %c0_23, %c0_24] : memref<1x32x96xf32, #tpu.memory_space<vmem>>, vector<1x32x96xf32>
    %37 = vector.shape_cast %36 : vector<1x32x96xf32> to vector<32x96xf32>
    %cst_25 = arith.constant dense<0.000000e+00> : vector<8x96xf32>
    %38 = tpu.matmul %35, %37, %cst_25 {dimension_numbers = #tpu.dot_dimension_numbers<[1], [0], [0], [1], [0, 0, 1, 1], [], []>} : vector<8x32xf32>, vector<32x96xf32>, vector<8x96xf32> -> vector<8x96xf32>
    %39 = vector.extract_strided_slice %38 {offsets = [0, 0], sizes = [8, 32], strides = [1, 1]} : vector<8x96xf32> to vector<8x32xf32>
    %40 = vector.extract_strided_slice %38 {offsets = [0, 32], sizes = [8, 32], strides = [1, 1]} : vector<8x96xf32> to vector<8x32xf32>
    %41 = vector.extract_strided_slice %38 {offsets = [0, 64], sizes = [8, 32], strides = [1, 1]} : vector<8x96xf32> to vector<8x32xf32>
    %42 = vector.shape_cast %39 : vector<8x32xf32> to vector<1x8x32xf32>
    %43 = vector.shape_cast %40 : vector<8x32xf32> to vector<1x8x32xf32>
    %44 = vector.shape_cast %41 : vector<8x32xf32> to vector<1x8x32xf32>
    %45 = vector.extract_strided_slice %42 {offsets = [0, 0, 0], sizes = [1, 8, 8], strides = [1, 1, 1]} : vector<1x8x32xf32> to vector<1x8x8xf32>
    %46 = vector.extract_strided_slice %43 {offsets = [0, 0, 0], sizes = [1, 8, 8], strides = [1, 1, 1]} : vector<1x8x32xf32> to vector<1x8x8xf32>
    "tpu.trace_start"() <{level = 10 : i32, message = "bqd,bkd->bqk"}> : () -> ()
    %cst_26 = arith.constant dense<0.000000e+00> : vector<1x8x8xf32>
    %47 = tpu.matmul %45, %46, %cst_26 {dimension_numbers = #tpu.dot_dimension_numbers<[2], [2], [1], [1], [0, 0, 0, 1, 1, 1], [0], [0]>} : vector<1x8x8xf32>, vector<1x8x8xf32>, vector<1x8x8xf32> -> vector<1x8x8xf32>
    "tpu.trace_stop"() : () -> ()
    %cst_27 = arith.constant dense<0xFF800000> : vector<1x8xf32>
    %48 = vector.multi_reduction <maximumf>, %47, %cst_27 [2] : vector<1x8x8xf32> to vector<1x8xf32>
    %49 = vector.shape_cast %48 : vector<1x8xf32> to vector<1x8x1xf32>
    %50 = vector.broadcast %49 : vector<1x8x1xf32> to vector<1x8x8xf32>
    %51 = arith.subf %47, %50 : vector<1x8x8xf32>
    %52 = math.exp %51 : vector<1x8x8xf32>
    %cst_28 = arith.constant dense<0.000000e+00> : vector<1x8xf32>
    %53 = vector.multi_reduction <add>, %52, %cst_28 [2] : vector<1x8x8xf32> to vector<1x8xf32>
    %54 = vector.shape_cast %53 : vector<1x8xf32> to vector<1x8x1xf32>
    %55 = vector.broadcast %54 : vector<1x8x1xf32> to vector<1x8x8xf32>
    %56 = arith.divf %52, %55 : vector<1x8x8xf32>
    %57 = vector.extract_strided_slice %44 {offsets = [0, 0, 0], sizes = [1, 8, 8], strides = [1, 1, 1]} : vector<1x8x32xf32> to vector<1x8x8xf32>
    "tpu.trace_start"() <{level = 10 : i32, message = "bqk,bkd->bqd"}> : () -> ()
    %cst_29 = arith.constant dense<0.000000e+00> : vector<1x8x8xf32>
    %58 = tpu.matmul %56, %57, %cst_29 {dimension_numbers = #tpu.dot_dimension_numbers<[2], [1], [1], [2], [0, 0, 0, 1, 1, 2], [0], [0]>} : vector<1x8x8xf32>, vector<1x8x8xf32>, vector<1x8x8xf32> -> vector<1x8x8xf32>
    "tpu.trace_stop"() : () -> ()
    %59 = vector.extract_strided_slice %42 {offsets = [0, 0, 8], sizes = [1, 8, 8], strides = [1, 1, 1]} : vector<1x8x32xf32> to vector<1x8x8xf32>
    %60 = vector.extract_strided_slice %43 {offsets = [0, 0, 8], sizes = [1, 8, 8], strides = [1, 1, 1]} : vector<1x8x32xf32> to vector<1x8x8xf32>
    "tpu.trace_start"() <{level = 10 : i32, message = "bqd,bkd->bqk"}> : () -> ()
    %cst_30 = arith.constant dense<0.000000e+00> : vector<1x8x8xf32>
    %61 = tpu.matmul %59, %60, %cst_30 {dimension_numbers = #tpu.dot_dimension_numbers<[2], [2], [1], [1], [0, 0, 0, 1, 1, 1], [0], [0]>} : vector<1x8x8xf32>, vector<1x8x8xf32>, vector<1x8x8xf32> -> vector<1x8x8xf32>
    "tpu.trace_stop"() : () -> ()
    %cst_31 = arith.constant dense<0xFF800000> : vector<1x8xf32>
    %62 = vector.multi_reduction <maximumf>, %61, %cst_31 [2] : vector<1x8x8xf32> to vector<1x8xf32>
    %63 = vector.shape_cast %62 : vector<1x8xf32> to vector<1x8x1xf32>
    %64 = vector.broadcast %63 : vector<1x8x1xf32> to vector<1x8x8xf32>
    %65 = arith.subf %61, %64 : vector<1x8x8xf32>
    %66 = math.exp %65 : vector<1x8x8xf32>
    %cst_32 = arith.constant dense<0.000000e+00> : vector<1x8xf32>
    %67 = vector.multi_reduction <add>, %66, %cst_32 [2] : vector<1x8x8xf32> to vector<1x8xf32>
    %68 = vector.shape_cast %67 : vector<1x8xf32> to vector<1x8x1xf32>
    %69 = vector.broadcast %68 : vector<1x8x1xf32> to vector<1x8x8xf32>
    %70 = arith.divf %66, %69 : vector<1x8x8xf32>
    %71 = vector.extract_strided_slice %44 {offsets = [0, 0, 8], sizes = [1, 8, 8], strides = [1, 1, 1]} : vector<1x8x32xf32> to vector<1x8x8xf32>
    "tpu.trace_start"() <{level = 10 : i32, message = "bqk,bkd->bqd"}> : () -> ()
    %cst_33 = arith.constant dense<0.000000e+00> : vector<1x8x8xf32>
    %72 = tpu.matmul %70, %71, %cst_33 {dimension_numbers = #tpu.dot_dimension_numbers<[2], [1], [1], [2], [0, 0, 0, 1, 1, 2], [0], [0]>} : vector<1x8x8xf32>, vector<1x8x8xf32>, vector<1x8x8xf32> -> vector<1x8x8xf32>
    "tpu.trace_stop"() : () -> ()
    %73 = vector.extract_strided_slice %42 {offsets = [0, 0, 16], sizes = [1, 8, 8], strides = [1, 1, 1]} : vector<1x8x32xf32> to vector<1x8x8xf32>
    %74 = vector.extract_strided_slice %43 {offsets = [0, 0, 16], sizes = [1, 8, 8], strides = [1, 1, 1]} : vector<1x8x32xf32> to vector<1x8x8xf32>
    "tpu.trace_start"() <{level = 10 : i32, message = "bqd,bkd->bqk"}> : () -> ()
    %cst_34 = arith.constant dense<0.000000e+00> : vector<1x8x8xf32>
    %75 = tpu.matmul %73, %74, %cst_34 {dimension_numbers = #tpu.dot_dimension_numbers<[2], [2], [1], [1], [0, 0, 0, 1, 1, 1], [0], [0]>} : vector<1x8x8xf32>, vector<1x8x8xf32>, vector<1x8x8xf32> -> vector<1x8x8xf32>
    "tpu.trace_stop"() : () -> ()
    %cst_35 = arith.constant dense<0xFF800000> : vector<1x8xf32>
    %76 = vector.multi_reduction <maximumf>, %75, %cst_35 [2] : vector<1x8x8xf32> to vector<1x8xf32>
    %77 = vector.shape_cast %76 : vector<1x8xf32> to vector<1x8x1xf32>
    %78 = vector.broadcast %77 : vector<1x8x1xf32> to vector<1x8x8xf32>
    %79 = arith.subf %75, %78 : vector<1x8x8xf32>
    %80 = math.exp %79 : vector<1x8x8xf32>
    %cst_36 = arith.constant dense<0.000000e+00> : vector<1x8xf32>
    %81 = vector.multi_reduction <add>, %80, %cst_36 [2] : vector<1x8x8xf32> to vector<1x8xf32>
    %82 = vector.shape_cast %81 : vector<1x8xf32> to vector<1x8x1xf32>
    %83 = vector.broadcast %82 : vector<1x8x1xf32> to vector<1x8x8xf32>
    %84 = arith.divf %80, %83 : vector<1x8x8xf32>
    %85 = vector.extract_strided_slice %44 {offsets = [0, 0, 16], sizes = [1, 8, 8], strides = [1, 1, 1]} : vector<1x8x32xf32> to vector<1x8x8xf32>
    "tpu.trace_start"() <{level = 10 : i32, message = "bqk,bkd->bqd"}> : () -> ()
    %cst_37 = arith.constant dense<0.000000e+00> : vector<1x8x8xf32>
    %86 = tpu.matmul %84, %85, %cst_37 {dimension_numbers = #tpu.dot_dimension_numbers<[2], [1], [1], [2], [0, 0, 0, 1, 1, 2], [0], [0]>} : vector<1x8x8xf32>, vector<1x8x8xf32>, vector<1x8x8xf32> -> vector<1x8x8xf32>
    "tpu.trace_stop"() : () -> ()
    %87 = vector.extract_strided_slice %42 {offsets = [0, 0, 24], sizes = [1, 8, 8], strides = [1, 1, 1]} : vector<1x8x32xf32> to vector<1x8x8xf32>
    %88 = vector.extract_strided_slice %43 {offsets = [0, 0, 24], sizes = [1, 8, 8], strides = [1, 1, 1]} : vector<1x8x32xf32> to vector<1x8x8xf32>
    "tpu.trace_start"() <{level = 10 : i32, message = "bqd,bkd->bqk"}> : () -> ()
    %cst_38 = arith.constant dense<0.000000e+00> : vector<1x8x8xf32>
    %89 = tpu.matmul %87, %88, %cst_38 {dimension_numbers = #tpu.dot_dimension_numbers<[2], [2], [1], [1], [0, 0, 0, 1, 1, 1], [0], [0]>} : vector<1x8x8xf32>, vector<1x8x8xf32>, vector<1x8x8xf32> -> vector<1x8x8xf32>
    "tpu.trace_stop"() : () -> ()
    %cst_39 = arith.constant dense<0xFF800000> : vector<1x8xf32>
    %90 = vector.multi_reduction <maximumf>, %89, %cst_39 [2] : vector<1x8x8xf32> to vector<1x8xf32>
    %91 = vector.shape_cast %90 : vector<1x8xf32> to vector<1x8x1xf32>
    %92 = vector.broadcast %91 : vector<1x8x1xf32> to vector<1x8x8xf32>
    %93 = arith.subf %89, %92 : vector<1x8x8xf32>
    %94 = math.exp %93 : vector<1x8x8xf32>
    %cst_40 = arith.constant dense<0.000000e+00> : vector<1x8xf32>
    %95 = vector.multi_reduction <add>, %94, %cst_40 [2] : vector<1x8x8xf32> to vector<1x8xf32>
    %96 = vector.shape_cast %95 : vector<1x8xf32> to vector<1x8x1xf32>
    %97 = vector.broadcast %96 : vector<1x8x1xf32> to vector<1x8x8xf32>
    %98 = arith.divf %94, %97 : vector<1x8x8xf32>
    %99 = vector.extract_strided_slice %44 {offsets = [0, 0, 24], sizes = [1, 8, 8], strides = [1, 1, 1]} : vector<1x8x32xf32> to vector<1x8x8xf32>
    "tpu.trace_start"() <{level = 10 : i32, message = "bqk,bkd->bqd"}> : () -> ()
    %cst_41 = arith.constant dense<0.000000e+00> : vector<1x8x8xf32>
    %100 = tpu.matmul %98, %99, %cst_41 {dimension_numbers = #tpu.dot_dimension_numbers<[2], [1], [1], [2], [0, 0, 0, 1, 1, 2], [0], [0]>} : vector<1x8x8xf32>, vector<1x8x8xf32>, vector<1x8x8xf32> -> vector<1x8x8xf32>
    "tpu.trace_stop"() : () -> ()
    %101 = tpu.concatenate %58, %72, %86, %100 in 2 : vector<1x8x8xf32>, vector<1x8x8xf32>, vector<1x8x8xf32>, vector<1x8x8xf32> -> vector<1x8x32xf32>
    %102 = vector.shape_cast %101 : vector<1x8x32xf32> to vector<8x32xf32>
    %c0_42 = arith.constant 0 : index
    %c0_43 = arith.constant 0 : index
    %c0_44 = arith.constant 0 : index
    %103 = vector.load %arg9[%c0_42, %c0_43, %c0_44] : memref<1x32x32xf32, #tpu.memory_space<vmem>>, vector<1x32x32xf32>
    %104 = vector.shape_cast %103 : vector<1x32x32xf32> to vector<32x32xf32>
    %cst_45 = arith.constant dense<0.000000e+00> : vector<8x32xf32>
    %105 = tpu.matmul %102, %104, %cst_45 {dimension_numbers = #tpu.dot_dimension_numbers<[1], [0], [0], [1], [0, 0, 1, 1], [], []>} : vector<8x32xf32>, vector<32x32xf32>, vector<8x32xf32> -> vector<8x32xf32>
    %c0_46 = arith.constant 0 : index
    %c0_47 = arith.constant 0 : index
    %c0_48 = arith.constant 0 : index
    %106 = vector.load %arg10[%c0_46, %c0_47, %c0_48] : memref<1x1x32xf32, #tpu.memory_space<vmem>>, vector<1x1x32xf32>
    %107 = vector.shape_cast %106 : vector<1x1x32xf32> to vector<1x32xf32>
    %108 = vector.broadcast %107 : vector<1x32xf32> to vector<8x32xf32>
    %109 = arith.addf %105, %108 : vector<8x32xf32>
    %110 = vector.shape_cast %109 : vector<8x32xf32> to vector<1x8x32xf32>
    %111 = arith.addf %12, %110 : vector<1x8x32xf32>
    %c0_49 = arith.constant 0 : index
    %c0_50 = arith.constant 0 : index
    %c0_51 = arith.constant 0 : index
    %112 = vector.load %arg20[%c0_49, %c0_50, %c0_51] : memref<1x8x32xf32, #tpu.memory_space<vmem>>, vector<1x8x32xf32>
    %113 = vector.shape_cast %112 : vector<1x8x32xf32> to vector<8x32xf32>
    %114 = vector.broadcast %4 : vector<1x32xf32> to vector<8x32xf32>
    %115 = arith.mulf %113, %114 : vector<8x32xf32>
    %116 = vector.broadcast %6 : vector<1x32xf32> to vector<8x32xf32>
    %117 = arith.addf %115, %116 : vector<8x32xf32>
    %c0_52 = arith.constant 0 : index
    %c0_53 = arith.constant 0 : index
    %c0_54 = arith.constant 0 : index
    %118 = vector.load %arg11[%c0_52, %c0_53, %c0_54] : memref<1x32x64xf32, #tpu.memory_space<vmem>>, vector<1x32x64xf32>
    %119 = vector.shape_cast %118 : vector<1x32x64xf32> to vector<32x64xf32>
    %cst_55 = arith.constant dense<0.000000e+00> : vector<8x64xf32>
    %120 = tpu.matmul %117, %119, %cst_55 {dimension_numbers = #tpu.dot_dimension_numbers<[1], [0], [0], [1], [0, 0, 1, 1], [], []>} : vector<8x32xf32>, vector<32x64xf32>, vector<8x64xf32> -> vector<8x64xf32>
    %121 = vector.shape_cast %111 : vector<1x8x32xf32> to vector<8x32xf32>
    %c0_56 = arith.constant 0 : index
    %c0_57 = arith.constant 0 : index
    %c0_58 = arith.constant 0 : index
    %122 = vector.load %arg12[%c0_56, %c0_57, %c0_58] : memref<1x32x32xf32, #tpu.memory_space<vmem>>, vector<1x32x32xf32>
    %123 = vector.shape_cast %122 : vector<1x32x32xf32> to vector<32x32xf32>
    %cst_59 = arith.constant dense<0.000000e+00> : vector<8x32xf32>
    %124 = tpu.matmul %121, %123, %cst_59 {dimension_numbers = #tpu.dot_dimension_numbers<[1], [0], [0], [1], [0, 0, 1, 1], [], []>} : vector<8x32xf32>, vector<32x32xf32>, vector<8x32xf32> -> vector<8x32xf32>
    %125 = vector.extract_strided_slice %120 {offsets = [0, 0], sizes = [8, 32], strides = [1, 1]} : vector<8x64xf32> to vector<8x32xf32>
    %126 = vector.extract_strided_slice %120 {offsets = [0, 32], sizes = [8, 32], strides = [1, 1]} : vector<8x64xf32> to vector<8x32xf32>
    %127 = vector.shape_cast %125 : vector<8x32xf32> to vector<1x8x32xf32>
    %128 = vector.shape_cast %126 : vector<8x32xf32> to vector<1x8x32xf32>
    %129 = vector.shape_cast %124 : vector<8x32xf32> to vector<1x8x32xf32>
    %130 = vector.extract_strided_slice %127 {offsets = [0, 0, 0], sizes = [1, 8, 8], strides = [1, 1, 1]} : vector<1x8x32xf32> to vector<1x8x8xf32>
    %131 = vector.extract_strided_slice %128 {offsets = [0, 0, 0], sizes = [1, 8, 8], strides = [1, 1, 1]} : vector<1x8x32xf32> to vector<1x8x8xf32>
    "tpu.trace_start"() <{level = 10 : i32, message = "bqd,bkd->bqk"}> : () -> ()
    %cst_60 = arith.constant dense<0.000000e+00> : vector<1x8x8xf32>
    %132 = tpu.matmul %130, %131, %cst_60 {dimension_numbers = #tpu.dot_dimension_numbers<[2], [2], [1], [1], [0, 0, 0, 1, 1, 1], [0], [0]>} : vector<1x8x8xf32>, vector<1x8x8xf32>, vector<1x8x8xf32> -> vector<1x8x8xf32>
    "tpu.trace_stop"() : () -> ()
    %cst_61 = arith.constant dense<0xFF800000> : vector<1x8xf32>
    %133 = vector.multi_reduction <maximumf>, %132, %cst_61 [2] : vector<1x8x8xf32> to vector<1x8xf32>
    %134 = vector.shape_cast %133 : vector<1x8xf32> to vector<1x8x1xf32>
    %135 = vector.broadcast %134 : vector<1x8x1xf32> to vector<1x8x8xf32>
    %136 = arith.subf %132, %135 : vector<1x8x8xf32>
    %137 = math.exp %136 : vector<1x8x8xf32>
    %cst_62 = arith.constant dense<0.000000e+00> : vector<1x8xf32>
    %138 = vector.multi_reduction <add>, %137, %cst_62 [2] : vector<1x8x8xf32> to vector<1x8xf32>
    %139 = vector.shape_cast %138 : vector<1x8xf32> to vector<1x8x1xf32>
    %140 = vector.broadcast %139 : vector<1x8x1xf32> to vector<1x8x8xf32>
    %141 = arith.divf %137, %140 : vector<1x8x8xf32>
    %142 = vector.extract_strided_slice %129 {offsets = [0, 0, 0], sizes = [1, 8, 8], strides = [1, 1, 1]} : vector<1x8x32xf32> to vector<1x8x8xf32>
    "tpu.trace_start"() <{level = 10 : i32, message = "bqk,bkd->bqd"}> : () -> ()
    %cst_63 = arith.constant dense<0.000000e+00> : vector<1x8x8xf32>
    %143 = tpu.matmul %141, %142, %cst_63 {dimension_numbers = #tpu.dot_dimension_numbers<[2], [1], [1], [2], [0, 0, 0, 1, 1, 2], [0], [0]>} : vector<1x8x8xf32>, vector<1x8x8xf32>, vector<1x8x8xf32> -> vector<1x8x8xf32>
    "tpu.trace_stop"() : () -> ()
    %144 = vector.extract_strided_slice %127 {offsets = [0, 0, 8], sizes = [1, 8, 8], strides = [1, 1, 1]} : vector<1x8x32xf32> to vector<1x8x8xf32>
    %145 = vector.extract_strided_slice %128 {offsets = [0, 0, 8], sizes = [1, 8, 8], strides = [1, 1, 1]} : vector<1x8x32xf32> to vector<1x8x8xf32>
    "tpu.trace_start"() <{level = 10 : i32, message = "bqd,bkd->bqk"}> : () -> ()
    %cst_64 = arith.constant dense<0.000000e+00> : vector<1x8x8xf32>
    %146 = tpu.matmul %144, %145, %cst_64 {dimension_numbers = #tpu.dot_dimension_numbers<[2], [2], [1], [1], [0, 0, 0, 1, 1, 1], [0], [0]>} : vector<1x8x8xf32>, vector<1x8x8xf32>, vector<1x8x8xf32> -> vector<1x8x8xf32>
    "tpu.trace_stop"() : () -> ()
    %cst_65 = arith.constant dense<0xFF800000> : vector<1x8xf32>
    %147 = vector.multi_reduction <maximumf>, %146, %cst_65 [2] : vector<1x8x8xf32> to vector<1x8xf32>
    %148 = vector.shape_cast %147 : vector<1x8xf32> to vector<1x8x1xf32>
    %149 = vector.broadcast %148 : vector<1x8x1xf32> to vector<1x8x8xf32>
    %150 = arith.subf %146, %149 : vector<1x8x8xf32>
    %151 = math.exp %150 : vector<1x8x8xf32>
    %cst_66 = arith.constant dense<0.000000e+00> : vector<1x8xf32>
    %152 = vector.multi_reduction <add>, %151, %cst_66 [2] : vector<1x8x8xf32> to vector<1x8xf32>
    %153 = vector.shape_cast %152 : vector<1x8xf32> to vector<1x8x1xf32>
    %154 = vector.broadcast %153 : vector<1x8x1xf32> to vector<1x8x8xf32>
    %155 = arith.divf %151, %154 : vector<1x8x8xf32>
    %156 = vector.extract_strided_slice %129 {offsets = [0, 0, 8], sizes = [1, 8, 8], strides = [1, 1, 1]} : vector<1x8x32xf32> to vector<1x8x8xf32>
    "tpu.trace_start"() <{level = 10 : i32, message = "bqk,bkd->bqd"}> : () -> ()
    %cst_67 = arith.constant dense<0.000000e+00> : vector<1x8x8xf32>
    %157 = tpu.matmul %155, %156, %cst_67 {dimension_numbers = #tpu.dot_dimension_numbers<[2], [1], [1], [2], [0, 0, 0, 1, 1, 2], [0], [0]>} : vector<1x8x8xf32>, vector<1x8x8xf32>, vector<1x8x8xf32> -> vector<1x8x8xf32>
    "tpu.trace_stop"() : () -> ()
    %158 = vector.extract_strided_slice %127 {offsets = [0, 0, 16], sizes = [1, 8, 8], strides = [1, 1, 1]} : vector<1x8x32xf32> to vector<1x8x8xf32>
    %159 = vector.extract_strided_slice %128 {offsets = [0, 0, 16], sizes = [1, 8, 8], strides = [1, 1, 1]} : vector<1x8x32xf32> to vector<1x8x8xf32>
    "tpu.trace_start"() <{level = 10 : i32, message = "bqd,bkd->bqk"}> : () -> ()
    %cst_68 = arith.constant dense<0.000000e+00> : vector<1x8x8xf32>
    %160 = tpu.matmul %158, %159, %cst_68 {dimension_numbers = #tpu.dot_dimension_numbers<[2], [2], [1], [1], [0, 0, 0, 1, 1, 1], [0], [0]>} : vector<1x8x8xf32>, vector<1x8x8xf32>, vector<1x8x8xf32> -> vector<1x8x8xf32>
    "tpu.trace_stop"() : () -> ()
    %cst_69 = arith.constant dense<0xFF800000> : vector<1x8xf32>
    %161 = vector.multi_reduction <maximumf>, %160, %cst_69 [2] : vector<1x8x8xf32> to vector<1x8xf32>
    %162 = vector.shape_cast %161 : vector<1x8xf32> to vector<1x8x1xf32>
    %163 = vector.broadcast %162 : vector<1x8x1xf32> to vector<1x8x8xf32>
    %164 = arith.subf %160, %163 : vector<1x8x8xf32>
    %165 = math.exp %164 : vector<1x8x8xf32>
    %cst_70 = arith.constant dense<0.000000e+00> : vector<1x8xf32>
    %166 = vector.multi_reduction <add>, %165, %cst_70 [2] : vector<1x8x8xf32> to vector<1x8xf32>
    %167 = vector.shape_cast %166 : vector<1x8xf32> to vector<1x8x1xf32>
    %168 = vector.broadcast %167 : vector<1x8x1xf32> to vector<1x8x8xf32>
    %169 = arith.divf %165, %168 : vector<1x8x8xf32>
    %170 = vector.extract_strided_slice %129 {offsets = [0, 0, 16], sizes = [1, 8, 8], strides = [1, 1, 1]} : vector<1x8x32xf32> to vector<1x8x8xf32>
    "tpu.trace_start"() <{level = 10 : i32, message = "bqk,bkd->bqd"}> : () -> ()
    %cst_71 = arith.constant dense<0.000000e+00> : vector<1x8x8xf32>
    %171 = tpu.matmul %169, %170, %cst_71 {dimension_numbers = #tpu.dot_dimension_numbers<[2], [1], [1], [2], [0, 0, 0, 1, 1, 2], [0], [0]>} : vector<1x8x8xf32>, vector<1x8x8xf32>, vector<1x8x8xf32> -> vector<1x8x8xf32>
    "tpu.trace_stop"() : () -> ()
    %172 = vector.extract_strided_slice %127 {offsets = [0, 0, 24], sizes = [1, 8, 8], strides = [1, 1, 1]} : vector<1x8x32xf32> to vector<1x8x8xf32>
    %173 = vector.extract_strided_slice %128 {offsets = [0, 0, 24], sizes = [1, 8, 8], strides = [1, 1, 1]} : vector<1x8x32xf32> to vector<1x8x8xf32>
    "tpu.trace_start"() <{level = 10 : i32, message = "bqd,bkd->bqk"}> : () -> ()
    %cst_72 = arith.constant dense<0.000000e+00> : vector<1x8x8xf32>
    %174 = tpu.matmul %172, %173, %cst_72 {dimension_numbers = #tpu.dot_dimension_numbers<[2], [2], [1], [1], [0, 0, 0, 1, 1, 1], [0], [0]>} : vector<1x8x8xf32>, vector<1x8x8xf32>, vector<1x8x8xf32> -> vector<1x8x8xf32>
    "tpu.trace_stop"() : () -> ()
    %cst_73 = arith.constant dense<0xFF800000> : vector<1x8xf32>
    %175 = vector.multi_reduction <maximumf>, %174, %cst_73 [2] : vector<1x8x8xf32> to vector<1x8xf32>
    %176 = vector.shape_cast %175 : vector<1x8xf32> to vector<1x8x1xf32>
    %177 = vector.broadcast %176 : vector<1x8x1xf32> to vector<1x8x8xf32>
    %178 = arith.subf %174, %177 : vector<1x8x8xf32>
    %179 = math.exp %178 : vector<1x8x8xf32>
    %cst_74 = arith.constant dense<0.000000e+00> : vector<1x8xf32>
    %180 = vector.multi_reduction <add>, %179, %cst_74 [2] : vector<1x8x8xf32> to vector<1x8xf32>
    %181 = vector.shape_cast %180 : vector<1x8xf32> to vector<1x8x1xf32>
    %182 = vector.broadcast %181 : vector<1x8x1xf32> to vector<1x8x8xf32>
    %183 = arith.divf %179, %182 : vector<1x8x8xf32>
    %184 = vector.extract_strided_slice %129 {offsets = [0, 0, 24], sizes = [1, 8, 8], strides = [1, 1, 1]} : vector<1x8x32xf32> to vector<1x8x8xf32>
    "tpu.trace_start"() <{level = 10 : i32, message = "bqk,bkd->bqd"}> : () -> ()
    %cst_75 = arith.constant dense<0.000000e+00> : vector<1x8x8xf32>
    %185 = tpu.matmul %183, %184, %cst_75 {dimension_numbers = #tpu.dot_dimension_numbers<[2], [1], [1], [2], [0, 0, 0, 1, 1, 2], [0], [0]>} : vector<1x8x8xf32>, vector<1x8x8xf32>, vector<1x8x8xf32> -> vector<1x8x8xf32>
    "tpu.trace_stop"() : () -> ()
    %186 = tpu.concatenate %143, %157, %171, %185 in 2 : vector<1x8x8xf32>, vector<1x8x8xf32>, vector<1x8x8xf32>, vector<1x8x8xf32> -> vector<1x8x32xf32>
    %187 = vector.shape_cast %186 : vector<1x8x32xf32> to vector<8x32xf32>
    %c0_76 = arith.constant 0 : index
    %c0_77 = arith.constant 0 : index
    %c0_78 = arith.constant 0 : index
    %188 = vector.load %arg13[%c0_76, %c0_77, %c0_78] : memref<1x32x32xf32, #tpu.memory_space<vmem>>, vector<1x32x32xf32>
    %189 = vector.shape_cast %188 : vector<1x32x32xf32> to vector<32x32xf32>
    %cst_79 = arith.constant dense<0.000000e+00> : vector<8x32xf32>
    %190 = tpu.matmul %187, %189, %cst_79 {dimension_numbers = #tpu.dot_dimension_numbers<[1], [0], [0], [1], [0, 0, 1, 1], [], []>} : vector<8x32xf32>, vector<32x32xf32>, vector<8x32xf32> -> vector<8x32xf32>
    %c0_80 = arith.constant 0 : index
    %c0_81 = arith.constant 0 : index
    %c0_82 = arith.constant 0 : index
    %191 = vector.load %arg14[%c0_80, %c0_81, %c0_82] : memref<1x1x32xf32, #tpu.memory_space<vmem>>, vector<1x1x32xf32>
    %192 = vector.shape_cast %191 : vector<1x1x32xf32> to vector<1x32xf32>
    %193 = vector.broadcast %192 : vector<1x32xf32> to vector<8x32xf32>
    %194 = arith.addf %190, %193 : vector<8x32xf32>
    %195 = vector.shape_cast %194 : vector<8x32xf32> to vector<1x8x32xf32>
    %196 = arith.addf %11, %195 : vector<1x8x32xf32>
    %197 = vector.shape_cast %196 : vector<1x8x32xf32> to vector<8x32xf32>
    %cst_83 = arith.constant dense<0.000000e+00> : vector<8xf32>
    %198 = vector.multi_reduction <add>, %197, %cst_83 [1] : vector<8x32xf32> to vector<8xf32>
    %199 = vector.shape_cast %198 : vector<8xf32> to vector<8x1xf32>
    %cst_84 = arith.constant 3.200000e+01 : f32
    %200 = vector.broadcast %cst_84 : f32 to vector<8x1xf32>
    %201 = arith.divf %199, %200 : vector<8x1xf32>
    %202 = vector.broadcast %201 : vector<8x1xf32> to vector<8x32xf32>
    %203 = arith.subf %197, %202 : vector<8x32xf32>
    %204 = arith.mulf %203, %203 : vector<8x32xf32>
    %cst_85 = arith.constant dense<0.000000e+00> : vector<8xf32>
    %205 = vector.multi_reduction <add>, %204, %cst_85 [1] : vector<8x32xf32> to vector<8xf32>
    %206 = vector.shape_cast %205 : vector<8xf32> to vector<8x1xf32>
    %cst_86 = arith.constant 3.200000e+01 : f32
    %207 = vector.broadcast %cst_86 : f32 to vector<8x1xf32>
    %208 = arith.divf %206, %207 : vector<8x1xf32>
    %209 = vector.broadcast %201 : vector<8x1xf32> to vector<8x32xf32>
    %210 = arith.subf %197, %209 : vector<8x32xf32>
    %cst_87 = arith.constant 9.99999974E-6 : f32
    %211 = vector.broadcast %cst_87 : f32 to vector<8x1xf32>
    %212 = arith.addf %208, %211 : vector<8x1xf32>
    %213 = math.rsqrt %212 : vector<8x1xf32>
    %214 = vector.broadcast %213 : vector<8x1xf32> to vector<8x32xf32>
    %215 = arith.mulf %210, %214 : vector<8x32xf32>
    %216 = vector.broadcast %8 : vector<1x32xf32> to vector<8x32xf32>
    %217 = arith.mulf %215, %216 : vector<8x32xf32>
    %218 = vector.broadcast %10 : vector<1x32xf32> to vector<8x32xf32>
    %219 = arith.addf %217, %218 : vector<8x32xf32>
    %c0_88 = arith.constant 0 : index
    %c0_89 = arith.constant 0 : index
    %c0_90 = arith.constant 0 : index
    %220 = vector.load %arg15[%c0_88, %c0_89, %c0_90] : memref<1x32x64xf32, #tpu.memory_space<vmem>>, vector<1x32x64xf32>
    %221 = vector.shape_cast %220 : vector<1x32x64xf32> to vector<32x64xf32>
    %cst_91 = arith.constant dense<0.000000e+00> : vector<8x64xf32>
    %222 = tpu.matmul %219, %221, %cst_91 {dimension_numbers = #tpu.dot_dimension_numbers<[1], [0], [0], [1], [0, 0, 1, 1], [], []>} : vector<8x32xf32>, vector<32x64xf32>, vector<8x64xf32> -> vector<8x64xf32>
    %c0_92 = arith.constant 0 : index
    %c0_93 = arith.constant 0 : index
    %c0_94 = arith.constant 0 : index
    %223 = vector.load %arg16[%c0_92, %c0_93, %c0_94] : memref<1x1x64xf32, #tpu.memory_space<vmem>>, vector<1x1x64xf32>
    %224 = vector.shape_cast %223 : vector<1x1x64xf32> to vector<1x64xf32>
    %225 = vector.broadcast %224 : vector<1x64xf32> to vector<8x64xf32>
    %226 = arith.addf %222, %225 : vector<8x64xf32>
    %cst_95 = arith.constant 0.000000e+00 : f32
    %227 = vector.broadcast %cst_95 : f32 to vector<8x64xf32>
    %228 = arith.maximumf %226, %227 : vector<8x64xf32>
    %c0_96 = arith.constant 0 : index
    %c0_97 = arith.constant 0 : index
    %c0_98 = arith.constant 0 : index
    %229 = vector.load %arg17[%c0_96, %c0_97, %c0_98] : memref<1x64x32xf32, #tpu.memory_space<vmem>>, vector<1x64x32xf32>
    %230 = vector.shape_cast %229 : vector<1x64x32xf32> to vector<64x32xf32>
    %cst_99 = arith.constant dense<0.000000e+00> : vector<8x32xf32>
    %231 = tpu.matmul %228, %230, %cst_99 {dimension_numbers = #tpu.dot_dimension_numbers<[1], [0], [0], [1], [0, 0, 1, 1], [], []>} : vector<8x64xf32>, vector<64x32xf32>, vector<8x32xf32> -> vector<8x32xf32>
    %c0_100 = arith.constant 0 : index
    %c0_101 = arith.constant 0 : index
    %c0_102 = arith.constant 0 : index
    %232 = vector.load %arg18[%c0_100, %c0_101, %c0_102] : memref<1x1x32xf32, #tpu.memory_space<vmem>>, vector<1x1x32xf32>
    %233 = vector.shape_cast %232 : vector<1x1x32xf32> to vector<1x32xf32>
    %234 = vector.broadcast %233 : vector<1x32xf32> to vector<8x32xf32>
    %235 = arith.addf %231, %234 : vector<8x32xf32>
    %236 = vector.shape_cast %235 : vector<8x32xf32> to vector<1x8x32xf32>
    %237 = arith.addf %196, %236 : vector<1x8x32xf32>
    %c0_103 = arith.constant 0 : index
    %c0_104 = arith.constant 0 : index
    %c0_105 = arith.constant 0 : index
    %238 = vector.load %arg19[%c0_103, %c0_104, %c0_105] : memref<1x8x32xf32, #tpu.memory_space<vmem>>, vector<1x8x32xf32>
    tpu.vector_store %arg19[%c0_103, %c0_104, %c0_105], %237 {strides = array<i32>} : memref<1x8x32xf32, #tpu.memory_space<vmem>>, vector<1x8x32xf32>,
    return
  }
  func.func @transform_0(%arg0: i32, %arg1: i32) -> (i32, i32, i32) {
    %c0_i32 = arith.constant 0 : i32
    %c0_i32_0 = arith.constant 0 : i32
    %c0_i32_1 = arith.constant 0 : i32
    return %arg0, %c0_i32, %c0_i32_0 : i32, i32, i32
  }
  func.func @transform_1(%arg0: i32, %arg1: i32) -> (i32, i32) {
    %c0_i32 = arith.constant 0 : i32
    %c0_i32_0 = arith.constant 0 : i32
    %c0_i32_1 = arith.constant 0 : i32
    return %c0_i32, %c0_i32_0 : i32, i32
  }
  func.func @transform_2(%arg0: i32, %arg1: i32) -> (i32, i32, i32) {
    %c0_i32 = arith.constant 0 : i32
    %c0_i32_0 = arith.constant 0 : i32
    %c0_i32_1 = arith.constant 0 : i32
    return %arg1, %c0_i32, %c0_i32_0 : i32, i32, i32
  }
  func.func @transform_3(%arg0: i32, %arg1: i32) -> (i32, i32, i32) {
    %c0_i32 = arith.constant 0 : i32
    %c0_i32_0 = arith.constant 0 : i32
    %c0_i32_1 = arith.constant 0 : i32
    return %arg1, %c0_i32, %c0_i32_0 : i32, i32, i32
  }
  func.func @transform_4(%arg0: i32, %arg1: i32) -> (i32, i32, i32) {
    %c0_i32 = arith.constant 0 : i32
    %c0_i32_0 = arith.constant 0 : i32
    %c0_i32_1 = arith.constant 0 : i32
    return %arg1, %c0_i32, %c0_i32_0 : i32, i32, i32
  }
  func.func @transform_5(%arg0: i32, %arg1: i32) -> (i32, i32, i32) {
    %c0_i32 = arith.constant 0 : i32
    %c0_i32_0 = arith.constant 0 : i32
    %c0_i32_1 = arith.constant 0 : i32
    return %arg1, %c0_i32, %c0_i32_0 : i32, i32, i32
  }
  func.func @transform_6(%arg0: i32, %arg1: i32) -> (i32, i32, i32) {
    %c0_i32 = arith.constant 0 : i32
    %c0_i32_0 = arith.constant 0 : i32
    %c0_i32_1 = arith.constant 0 : i32
    return %arg1, %c0_i32, %c0_i32_0 : i32, i32, i32
  }
  func.func @transform_7(%arg0: i32, %arg1: i32) -> (i32, i32, i32) {
    %c0_i32 = arith.constant 0 : i32
    %c0_i32_0 = arith.constant 0 : i32
    %c0_i32_1 = arith.constant 0 : i32
    return %arg1, %c0_i32, %c0_i32_0 : i32, i32, i32
  }
  func.func @transform_8(%arg0: i32, %arg1: i32) -> (i32, i32, i32) {
    %c0_i32 = arith.constant 0 : i32
    %c0_i32_0 = arith.constant 0 : i32
    %c0_i32_1 = arith.constant 0 : i32
    return %arg1, %c0_i32, %c0_i32_0 : i32, i32, i32
  }
  func.func @transform_9(%arg0: i32, %arg1: i32) -> (i32, i32, i32) {
    %c0_i32 = arith.constant 0 : i32
    %c0_i32_0 = arith.constant 0 : i32
    %c0_i32_1 = arith.constant 0 : i32
    return %arg1, %c0_i32, %c0_i32_0 : i32, i32, i32
  }
  func.func @transform_10(%arg0: i32, %arg1: i32) -> (i32, i32, i32) {
    %c0_i32 = arith.constant 0 : i32
    %c0_i32_0 = arith.constant 0 : i32
    %c0_i32_1 = arith.constant 0 : i32
    return %arg1, %c0_i32, %c0_i32_0 : i32, i32, i32
  }
  func.func @transform_11(%arg0: i32, %arg1: i32) -> (i32, i32, i32) {
    %c0_i32 = arith.constant 0 : i32
    %c0_i32_0 = arith.constant 0 : i32
    %c0_i32_1 = arith.constant 0 : i32
    return %arg1, %c0_i32, %c0_i32_0 : i32, i32, i32
  }
  func.func @transform_12(%arg0: i32, %arg1: i32) -> (i32, i32, i32) {
    %c0_i32 = arith.constant 0 : i32
    %c0_i32_0 = arith.constant 0 : i32
    %c0_i32_1 = arith.constant 0 : i32
    return %arg1, %c0_i32, %c0_i32_0 : i32, i32, i32
  }
  func.func @transform_13(%arg0: i32, %arg1: i32) -> (i32, i32, i32) {
    %c0_i32 = arith.constant 0 : i32
    %c0_i32_0 = arith.constant 0 : i32
    %c0_i32_1 = arith.constant 0 : i32
    return %arg1, %c0_i32, %c0_i32_0 : i32, i32, i32
  }
  func.func @transform_14(%arg0: i32, %arg1: i32) -> (i32, i32, i32) {
    %c0_i32 = arith.constant 0 : i32
    %c0_i32_0 = arith.constant 0 : i32
    %c0_i32_1 = arith.constant 0 : i32
    return %arg1, %c0_i32, %c0_i32_0 : i32, i32, i32
  }
  func.func @transform_15(%arg0: i32, %arg1: i32) -> (i32, i32, i32) {
    %c0_i32 = arith.constant 0 : i32
    %c0_i32_0 = arith.constant 0 : i32
    %c0_i32_1 = arith.constant 0 : i32
    return %arg1, %c0_i32, %c0_i32_0 : i32, i32, i32
  }
  func.func @transform_16(%arg0: i32, %arg1: i32) -> (i32, i32, i32) {
    %c0_i32 = arith.constant 0 : i32
    %c0_i32_0 = arith.constant 0 : i32
    %c0_i32_1 = arith.constant 0 : i32
    return %arg1, %c0_i32, %c0_i32_0 : i32, i32, i32
  }
  func.func @transform_17(%arg0: i32, %arg1: i32) -> (i32, i32, i32) {
    %c0_i32 = arith.constant 0 : i32
    %c0_i32_0 = arith.constant 0 : i32
    %c0_i32_1 = arith.constant 0 : i32
    return %arg0, %c0_i32, %c0_i32_0 : i32, i32, i32
  }
}

</mosaic_0001>

<bundles_post_ra>
// kernel: tpu_custom_call.1
= control target key start
LH: loop header
LB: loop body
LE: loop exit
PB: predicated region body
PF: predicated region fallthrough
CT: control target
= control target key end

     0   :  { %s5818_s0 = inlined_call_operand.hbm [shape: f32[2,8,32], index: 0, kind: input, shape index: {}]   ;;  %s5819_s1 = inlined_call_operand.hbm [shape: f32[8,32], index: 1, kind: input, shape index: {}]   ;;  %s5820_s2 = inlined_call_operand.hbm [shape: f32[2,1,32], index: 2, kind: input, shape index: {}]   ;;  %s5821_s3 = inlined_call_operand.hbm [shape: f32[2,1,32], index: 3, kind: input, shape index: {}]   ;;  %s5822_s4 = inlined_call_operand.hbm [shape: f32[2,1,32], index: 4, kind: input, shape index: {}]   ;;  %s5823_s5 = inlined_call_operand.hbm [shape: f32[2,1,32], index: 5, kind: input, shape index: {}]   ;;  %s5824_s6 = inlined_call_operand.hbm [shape: f32[2,32,96], index: 6, kind: input, shape index: {}]   ;;  %s5825_s7 = inlined_call_operand.hbm [shape: f32[2,32,32], index: 7, kind: input, shape index: {}]   ;;  %s5826_s8 = inlined_call_operand.hbm [shape: f32[2,1,32], index: 8, kind: input, shape index: {}]   ;;  %s5827_s9 = inlined_call_operand.hbm [shape: f32[2,32,64], index: 9, kind: input, shape index: {}]   ;;  %s5828_s10 = inlined_call_operand.hbm [shape: f32[2,32,32], index: 10, kind: input, shape index: {}]   ;;  %s5829_s11 = inlined_call_operand.hbm [shape: f32[2,32,32], index: 11, kind: input, shape index: {}]   ;;  %s5830_s12 = inlined_call_operand.hbm [shape: f32[2,1,32], index: 12, kind: input, shape index: {}]   ;;  %s5831_s13 = inlined_call_operand.hbm [shape: f32[2,32,64], index: 13, kind: input, shape index: {}]   ;;  %s5832_s14 = inlined_call_operand.hbm [shape: f32[2,1,64], index: 14, kind: input, shape index: {}]   ;;  %s5833_s15 = inlined_call_operand.hbm [shape: f32[2,64,32], index: 15, kind: input, shape index: {}]   ;;  %s5834_s16 = inlined_call_operand.hbm [shape: f32[2,1,32], index: 16, kind: input, shape index: {}]   ;;  %s5835_s17 = inlined_call_operand.hbm [shape: f32[2,8,32], index: 17, kind: output, shape index: {}]  }
   0x1   :  { %5876 = sst [smem:[#allocation42_spill]] %s5818_s0 }
   0x2   :  { %5877 = sst [smem:[#allocation43_spill]] %s5819_s1 }
   0x3   :  { %5878 = sst [smem:[#allocation44_spill]] %s5820_s2 }
   0x4   :  { %5879 = sst [smem:[#allocation45_spill]] %s5821_s3 }
   0x5   :  { %5880 = sst [smem:[#allocation46_spill]] %s5822_s4 }
   0x6   :  { %5881 = sst [smem:[#allocation47_spill]] %s5823_s5 }
   0x7   :  { %5882 = sst [smem:[#allocation48_spill]] %s5824_s6 }
   0x8   :  { %5883 = sst [smem:[#allocation49_spill]] %s5825_s7 }
   0x9   :  { %5884 = sst [smem:[#allocation50_spill]] %s5829_s11 }
   0xa   :  { %5885 = sst [smem:[#allocation51_spill]] %s5830_s12 }
   0xb   :  { %5886 = sst [smem:[#allocation52_spill]] %s5831_s13 }
   0xc   :  { %5887 = sst [smem:[#allocation53_spill]] %s5832_s14 }
   0xd   :  { %5888 = sst [smem:[#allocation54_spill]] %s5833_s15 }
   0xe   :  { %5889 = sst [smem:[#allocation55_spill]] %s5834_s16 }
   0xf   :  { %5890 = sst [smem:[#allocation56_spill]] %s5835_s17 }
  0x10   :  { %22 = vsyncpa [#allocation4], 0 }
  0x11   :  { %24 = vsyncpa [#allocation4 + $0x1], 0 }
  0x12   :  { %25 = vsyncpa [#allocation7], 0 }
  0x13   :  { %26 = vsyncpa [#allocation5], 0 }
  0x14   :  { %28 = vsyncpa [#allocation5 + $0x1], 0  ;;  %s4803_s24 = smov 0   ;;  %s4805_s25 = smov 0  }
  0x15   :  { %s4807_s26 = smov 0   ;;  %s4809_s27 = smov 0  }
  0x16   :  { %s4811_s28 = smov 0   ;;  %s4813_s29 = smov 0  }
  0x17   :  { %s4815_s0 = smov 0   ;;  %s4817_s30 = smov 0  }
  0x18   :  { %s4819_s18 = smov 0   ;;  %s4821_s19 = smov 0  }
  0x19   :  { %s4823_s1 = smov 0  }
  0x1a LB: > { %5891 = sst [smem:[#allocation28_spill]] %s4638_s25  ;;  %s4859_s20 = sadd.s32 4294967295, %s4674_s1   ;;  %s4674_s1 = sphi %s4823_s1, %s34_s1   ;;  %s4670_s19 = sphi %s4821_s19, %s5969_s19   ;;  %s4666_s18 = sphi %s4819_s18, %s5977_s18   ;;  %s4662_s30 = sphi %s4817_s30, %s5976_s30   ;;  %s4658_s0 = sphi %s4815_s0, %s5975_s0   ;;  %s4654_s29 = sphi %s4813_s29, %s5974_s29   ;;  %s4650_s28 = sphi %s4811_s28, %s5973_s28   ;;  %s4646_s27 = sphi %s4809_s27, %s5972_s27   ;;  %s4642_s26 = sphi %s4807_s26, %s5971_s26   ;;  %s4638_s25 = sphi %s4805_s25, %s5970_s25   ;;  %s4634_s24 = sphi %s4803_s24, %s5963_s24  }
  0x1b   : > { %5892 = sst [smem:[#allocation29_spill]] %s4646_s27  ;;  %s3492_s21 = sadd.s32 4294967294, %s4674_s1  }
  0x1c   : > { %5893 = sst [smem:[#allocation30_spill]] %s4654_s29  ;;  %s43_s22 = sadd.s32 1, %s4666_s18 }
  0x1d   : > { %5894 = sst [smem:[#allocation31_spill]] %s4658_s0  ;;  %s46_s23 = sadd.s32 1, %s4670_s19 }
  0x1e   : > { %5895 = sst [smem:[#allocation32_spill]] %s4662_s30  ;;  %p44_p0 = scmp.ge.s32.totalorder %s43_s22, 2 }
  0x1f   : > { %5896 = sst [smem:[#allocation33_spill]] %s4670_s19  ;;  %s53_s17 = sadd.s32 1, %s4654_s29 }
  0x20   : > { %p5847_p1 = scmp.ne.s32.totalorder %s4654_s29, %s4650_s28  ;;  %p61_p2 = scmp.eq.s32.totalorder %s4674_s1, 0 }
  0x21   : > { %s5979_s22 = smov (%p44_p0, %s43_s22), 0  ;;  %s5981_s23 = smov (!%p44_p0, %s46_s23), %s4670_s19 }
  0x22   : > { %5897 = sst [smem:[#allocation34_spill]] %s5979_s22  ;;  %p4876_p3 = por %p61_p2, %p5847_p1 }
  0x23   : > { %p5846_p4 = scmp.ne.s32.totalorder %s4650_s28, %s4646_s27  ;;  %p48_p5 = scmp.ge.s32.totalorder %s5981_s23, 2 }
  0x24   : > { %s5898_s30 = scalar_select %p4876_p3, 1, 0 }
  0x25   : > { %p5858_p6 = scmp.eq.s32.totalorder %s4859_s20, 0  ;;  %s97_s0 = ssub.s32 %s4666_s18, %s5979_s22 }
  0x26   : > { %s100_s16 = sadd.s32 1, %s4642_s26  ;;  %s5983_s23 = smov (%p48_p5, %s5981_s23), 0 }
  0x27   : > { %5899 = sst [smem:[#allocation35_spill]] %s5983_s23  ;;  %p4893_p7 = por %p5858_p6, %p5846_p4 }
  0x28   : > { %p98_p8 = scmp.eq.s32.totalorder %s97_s0, 0  ;;  %s50_s14 = ssub.s32 %s4670_s19, %s5983_s23 }
  0x29   : > { %s5900_s15 = scalar_select %p4893_p7, 1, 0 }
  0x2a   : > { %p107_p9 = scmp.ne.s32.totalorder %s4642_s26, %s4638_s25  ;;  %p51_p10 = scmp.eq.s32.totalorder %s50_s14, 0 }
  0x2b   : > { %5901 = sst [smem:[#allocation36_spill]] %s5900_s15  ;;  %p113_p11 = scmp.ne.s32.totalorder %s4638_s25, %s4634_s24 }
  0x2c   : > { %s4904_s22 = scalar_select %p98_p8, %s4642_s26, %s100_s16  }
  0x2d   : > { %s4907_s13 = scalar_select %p51_p10, %s4654_s29, %s53_s17  }
  0x2e   : > { %5902 = sst [smem:[#allocation37_spill]] %s4904_s22  ;;  %p4911_p12 = por %p107_p9, %p61_p2 }
  0x2f   : > { %5903 = sst [smem:[#allocation38_spill]] %s4907_s13  ;;  %p4917_p13 = por %p113_p11, %p5858_p6 }
  0x30   : > { %s5904_s12 = scalar_select %p4911_p12, 1, 0 }
  0x31   : > { %s5905_s11 = scalar_select %p4917_p13, 1, 0 }
  0x32   : > { %p501_p0 = scmp.eq.s32.totalorder %s4859_s20, 3  ;;  %p507_p5 = scmp.eq.s32.totalorder %s3492_s21, 3 }
  0x33   : > { %5906 = sst [smem:[#allocation39_spill]] %s5905_s11  ;;  %p3493_p4 = scmp.ge.s32.totalorder %s4674_s1, 1 }
  0x34   : > { %p514_p1 = scmp.lt.s32.totalorder %s4674_s1, 5  ;;  %p5907_p7 = scmp.ne.s32.totalorder %s4654_s29, %s4650_s28 }
  0x35   : > { %p5910_p8 = scmp.ne.s32.totalorder %s4650_s28, %s4646_s27  ;;  %s4676_s24 = smov [#allocation6]  }
  0x36   : > { %p4927_p3 = por %p501_p0, %p5907_p7  ;;  %p4938_p2 = pnand %p3493_p4, %p514_p1 }
  0x37   : > { %p4934_p10 = por %p507_p5, %p5910_p8  ;;  %s527_s0 = sshll.u32 %s4676_s24, 4  ;;  %s528_s0 = int_to_ptr.vmem [resolvable:$true] %s527_s0 }
  0x38   : > { %s5908_s14 = scalar_select %p4927_p3, 1, 0 }
  0x39   : > { %s5911_s16 = scalar_select %p4934_p10, 1, 0 }
  0x3a   : > { %5909 = sst [smem:[#allocation40_spill]] %s5908_s14  ;;  %p3911_p9 = pneg %p4938_p2 }
  0x3b   : > { %5912 = sst [smem:[#allocation41_spill]] %s5911_s16  ;;  %s5915_s22 = sld [smem:[#allocation43_spill]] }
  0x3c   : > { %s5913_s17 = scalar_select %p4938_p2, 1, 0 }
  0x3d   : > { %p4946_p7 = pnand %p3911_p9, %p5858_p6 }
  0x3f   : > { %p4070_p4 = pneg %p4946_p7 }
  0x41   : > { %s4068_s16 = scalar_lea.hbm %s5915_s22, 128 }
  0x42   : > { %p4069_p1 = scmp.ne.s32.totalorder %s5915_s22, %s4068_s16  ;;  %p4075_p5 = scmp.lt.u32.totalorder %s4068_s16, %s5915_s22 }
  0x44   : > { %p4071_p11 = pnand %p4070_p4, %p4069_p1 }
  0x46   : > { %p4072_p0 = pneg %p4071_p11 }
  0x48   : > { %p4077_p8 = pnand %p4075_p5, %p4072_p0 }
  0x4a   : > { %4080 = shalt.err (!%p4077_p8)
}
  0x4b   : > { %s4081_s25 = scalar_lea.vmem %s528_s0, 128  ;;  %p4089_p3 = scmp.lt.s32.totalorder %s528_s0, %s528_s0 }
  0x4c   : > { %p4082_p9 = scmp.ne.s32.totalorder %s528_s0, %s4081_s25  ;;  %p4090_p13 = scmp.lt.s32.totalorder %s4081_s25, %s4081_s25 }
  0x4e   : > { %p4084_p6 = pnand %p4082_p9, %p4070_p4  ;;  %p4091_p2 = por %p4090_p13, %p4089_p3 }
  0x50   : > { %p4085_p10 = pneg %p4084_p6 }
  0x52   : > { %p4092_p12 = pnand %p4091_p2, %p4085_p10 }
  0x54   : > { %4095 = shalt.err (!%p4092_p12)
}
  0x55   : > { %3914 = dma.hbm_to_vmem [thread:$0]  (!%p4946_p7), %s5915_s22, 128, %s528_s0, [#allocation7]  }
  0x56   : > { %p3495_p1 = scmp.ge.s32.totalorder %s4674_s1, 4 }
  0x57   : > { %s538_s11 = sand.u32 (!%p3495_p1), 1, %s4674_s1   ;;  %s540_s23 = sand.u32 (!%p3495_p1), 1, %s4654_s29  }
  0x58   : > { %534 = sbr.rel (%p3495_p1) target bundleno = 526 (0x20e), region = 20  ;;  %s3496_s25 = sshll.u32 (!%p3495_p1), %s540_s23, 3 }
  0x59   : > { %s3497_s14 = sshll.u32 (!%p3495_p1), %s4670_s19, 7  ;;  %s5916_s15 = sld [smem:[#allocation42_spill]] (!%p3495_p1) }
  0x5a   : > { %s542_s0 = scalar_lea.vmem (!%p3495_p1), [#allocation3], %s3496_s25  ;;  %s4978_s27 = sand.u32 (!%p3495_p1), 1, %s4642_s26  }
  0x5b   : > { %s549_s13 = sshll.u32 (!%p3495_p1), %s542_s0, 4  ;;  %s4980_s22 = scalar_lea.sflag (!%p3495_p1), [#allocation4], %s538_s11  ;;  %s4975_s13 = int_to_ptr.vmem [resolvable:$true] %s549_s13 }
  0x5c   : > { %p5917_p6 = scmp.ne.s32.totalorder (!%p3495_p1), %s5898_s30, 0 }
  0x5f   : > { %s4973_s21 = scalar_lea.hbm %s5916_s15, %s3497_s14  ;;  %s4100_s16 = scalar_lea.hbm %s5916_s15, 256 }
  0x60   : > { %s4096_s29 = scalar_lea.hbm %s4973_s21, 128  ;;  %p4101_p10 = scmp.lt.u32.totalorder %s4973_s21, %s5916_s15 }
  0x61   : > { %p4097_p3 = scmp.ne.s32.totalorder %s4973_s21, %s4096_s29  ;;  %p4102_p2 = scmp.lt.u32.totalorder %s4100_s16, %s4096_s29 }
  0x62   : > { %p4104_p4 = scmp.lt.u32.totalorder %s4096_s29, %s4973_s21 }
  0x63   : > { %p4098_p12 = pnand %p4097_p3, %p5917_p6  ;;  %p4103_p7 = por %p4102_p2, %p4101_p10 }
  0x65   : > { %p4099_p13 = pneg %p4098_p12  ;;  %p4105_p11 = por %p4104_p4, %p4103_p7 }
  0x67   : > { %p4106_p0 = pnand %p4105_p11, %p4099_p13 }
  0x69   : > { %4109 = shalt.err (!%p4106_p0)
}
  0x6a   : > { %s4110_s11 = scalar_lea.vmem %s4975_s13, 128  ;;  %s4677_s25 = smov [#allocation3]  }
  0x6b   : > { %p4111_p5 = scmp.ne.s32.totalorder %s4975_s13, %s4110_s11  ;;  %s4114_s0 = sshll.u32 %s4677_s25, 4  ;;  %s4115_s0 = int_to_ptr.vmem [resolvable:$false] %s4114_s0 }
  0x6c   : > { %s4116_s19 = scalar_lea.vmem %s4115_s0, 256  ;;  %p4117_p1 = scmp.lt.s32.totalorder %s4975_s13, %s4115_s0 }
  0x6d   : > { %p4112_p8 = pnand %p4111_p5, %p5917_p6  ;;  %p4118_p3 = scmp.lt.s32.totalorder %s4116_s19, %s4110_s11 }
  0x6f   : > { %p4113_p9 = pneg %p4112_p8  ;;  %p4119_p12 = por %p4118_p3, %p4117_p1 }
  0x71   : > { %p4120_p10 = pnand %p4119_p12, %p4113_p9 }
  0x73   : > { %4123 = shalt.err (!%p4120_p10)
}
  0x74   : > { %3875 = dma.hbm_to_vmem [thread:$0]  (%p5917_p6), %s4973_s21, 128, %s4975_s13, %s4980_s22  }
  0x75   : > { %s5005_s29 = sshll.u32 %s4666_s18, 4  ;;  %s5918_s2 = sld [smem:[#allocation44_spill]] }
  0x76   : > { %s559_s30 = scalar_lea.vmem [#allocation8], %s4978_s27  ;;  %p5919_p2 = scmp.ne.s32.totalorder %s5904_s12, 0 }
  0x77   : > { %s566_s24 = sshll.u32 %s559_s30, 4  ;;  %s567_s24 = int_to_ptr.vmem [resolvable:$true] %s566_s24 }
  0x7b   : > { %s5011_s16 = scalar_lea.hbm %s5918_s2, %s5005_s29  ;;  %s4128_s25 = scalar_lea.hbm %s5918_s2, 32 }
  0x7c   : > { %s4124_s11 = scalar_lea.hbm %s5011_s16, 16  ;;  %p4129_p4 = scmp.lt.u32.totalorder %s5011_s16, %s5918_s2 }
  0x7d   : > { %p4125_p13 = scmp.ne.s32.totalorder %s5011_s16, %s4124_s11  ;;  %p4130_p11 = scmp.lt.u32.totalorder %s4128_s25, %s4124_s11 }
  0x7e   : > { %p4132_p5 = scmp.lt.u32.totalorder %s4124_s11, %s5011_s16 }
  0x7f   : > { %p4126_p7 = pnand %p4125_p13, %p5919_p2  ;;  %p4131_p0 = por %p4130_p11, %p4129_p4 }
  0x81   : > { %p4127_p6 = pneg %p4126_p7  ;;  %p4133_p8 = por %p4132_p5, %p4131_p0 }
  0x83   : > { %p4134_p9 = pnand %p4133_p8, %p4127_p6 }
  0x85   : > { %4137 = shalt.err (!%p4134_p9)
}
  0x86   : > { %s4138_s23 = scalar_lea.vmem %s567_s24, 16  ;;  %s4678_s14 = smov [#allocation8]  }
  0x87   : > { %p4139_p1 = scmp.ne.s32.totalorder %s567_s24, %s4138_s23  ;;  %s4142_s30 = sshll.u32 %s4678_s14, 4  ;;  %s4143_s30 = int_to_ptr.vmem [resolvable:$false] %s4142_s30 }
  0x88   : > { %s4144_s21 = scalar_lea.vmem %s4143_s30, 32  ;;  %p4145_p10 = scmp.lt.s32.totalorder %s567_s24, %s4143_s30 }
  0x89   : > { %p4140_p3 = pnand %p4139_p1, %p5919_p2  ;;  %p4146_p13 = scmp.lt.s32.totalorder %s4144_s21, %s4138_s23 }
  0x8b   : > { %p4141_p12 = pneg %p4140_p3  ;;  %p4147_p7 = por %p4146_p13, %p4145_p10 }
  0x8d   : > { %p4148_p4 = pnand %p4147_p7, %p4141_p12 }
  0x8f   : > { %4151 = shalt.err (!%p4148_p4)
}
  0x90   : > { %3876 = dma.hbm_to_vmem [thread:$0]  (%p5919_p2), %s5011_s16, 16, %s567_s24, %s4980_s22  }
  0x91   : > { %s5920_s3 = sld [smem:[#allocation45_spill]]  ;;  %s576_s0 = scalar_lea.vmem [#allocation9], %s4978_s27 }
  0x92   : > { %s583_s19 = sshll.u32 %s576_s0, 4  ;;  %s584_s19 = int_to_ptr.vmem [resolvable:$true] %s583_s19 }
  0x97   : > { %s5036_s25 = scalar_lea.hbm %s5920_s3, %s5005_s29  ;;  %s4156_s16 = scalar_lea.hbm %s5920_s3, 32 }
  0x98   : > { %s4152_s23 = scalar_lea.hbm %s5036_s25, 16  ;;  %p4157_p5 = scmp.lt.u32.totalorder %s5036_s25, %s5920_s3 }
  0x99   : > { %p4153_p6 = scmp.ne.s32.totalorder %s5036_s25, %s4152_s23  ;;  %p4158_p8 = scmp.lt.u32.totalorder %s4156_s16, %s4152_s23 }
  0x9a   : > { %p4160_p1 = scmp.lt.u32.totalorder %s4152_s23, %s5036_s25 }
  0x9b   : > { %p4154_p11 = pnand %p4153_p6, %p5919_p2  ;;  %p4159_p9 = por %p4158_p8, %p4157_p5 }
  0x9d   : > { %p4155_p0 = pneg %p4154_p11  ;;  %p4161_p3 = por %p4160_p1, %p4159_p9 }
  0x9f   : > { %p4162_p12 = pnand %p4161_p3, %p4155_p0 }
  0xa1   : > { %4165 = shalt.err (!%p4162_p12)
}
  0xa2   : > { %s4166_s11 = scalar_lea.vmem %s584_s19, 16  ;;  %s4679_s13 = smov [#allocation9]  }
  0xa3   : > { %p4167_p10 = scmp.ne.s32.totalorder %s584_s19, %s4166_s11  ;;  %s4170_s0 = sshll.u32 %s4679_s13, 4  ;;  %s4171_s0 = int_to_ptr.vmem [resolvable:$false] %s4170_s0 }
  0xa4   : > { %s4172_s14 = scalar_lea.vmem %s4171_s0, 32  ;;  %p4173_p4 = scmp.lt.s32.totalorder %s584_s19, %s4171_s0 }
  0xa5   : > { %p4168_p13 = pnand %p4167_p10, %p5919_p2  ;;  %p4174_p6 = scmp.lt.s32.totalorder %s4172_s14, %s4166_s11 }
  0xa7   : > { %p4169_p7 = pneg %p4168_p13  ;;  %p4175_p11 = por %p4174_p6, %p4173_p4 }
  0xa9   : > { %p4176_p5 = pnand %p4175_p11, %p4169_p7 }
  0xab   : > { %4179 = shalt.err (!%p4176_p5)
}
  0xac   : > { %3877 = dma.hbm_to_vmem [thread:$0]  (%p5919_p2), %s5036_s25, 16, %s584_s19, %s4980_s22  }
  0xad   : > { %s5921_s4 = sld [smem:[#allocation46_spill]]  ;;  %s593_s24 = scalar_lea.vmem [#allocation10], %s4978_s27 }
  0xae   : > { %s600_s21 = sshll.u32 %s593_s24, 4  ;;  %s601_s21 = int_to_ptr.vmem [resolvable:$true] %s600_s21 }
  0xb3   : > { %s5061_s16 = scalar_lea.hbm %s5921_s4, %s5005_s29  ;;  %s4184_s25 = scalar_lea.hbm %s5921_s4, 32 }
  0xb4   : > { %s4180_s11 = scalar_lea.hbm %s5061_s16, 16  ;;  %p4185_p1 = scmp.lt.u32.totalorder %s5061_s16, %s5921_s4 }
  0xb5   : > { %p4181_p0 = scmp.ne.s32.totalorder %s5061_s16, %s4180_s11  ;;  %p4186_p3 = scmp.lt.u32.totalorder %s4184_s25, %s4180_s11 }
  0xb6   : > { %p4188_p10 = scmp.lt.u32.totalorder %s4180_s11, %s5061_s16 }
  0xb7   : > { %p4182_p8 = pnand %p4181_p0, %p5919_p2  ;;  %p4187_p12 = por %p4186_p3, %p4185_p1 }
  0xb9   : > { %p4183_p9 = pneg %p4182_p8  ;;  %p4189_p13 = por %p4188_p10, %p4187_p12 }
  0xbb   : > { %p4190_p7 = pnand %p4189_p13, %p4183_p9 }
  0xbd   : > { %4193 = shalt.err (!%p4190_p7)
}
  0xbe   : > { %s4194_s23 = scalar_lea.vmem %s601_s21, 16  ;;  %s4680_s30 = smov [#allocation10]  }
  0xbf   : > { %p4195_p4 = scmp.ne.s32.totalorder %s601_s21, %s4194_s23  ;;  %s4198_s24 = sshll.u32 %s4680_s30, 4  ;;  %s4199_s24 = int_to_ptr.vmem [resolvable:$false] %s4198_s24 }
  0xc0   : > { %s4200_s13 = scalar_lea.vmem %s4199_s24, 32  ;;  %p4201_p5 = scmp.lt.s32.totalorder %s601_s21, %s4199_s24 }
  0xc1   : > { %p4196_p6 = pnand %p4195_p4, %p5919_p2  ;;  %p4202_p0 = scmp.lt.s32.totalorder %s4200_s13, %s4194_s23 }
  0xc3   : > { %p4197_p11 = pneg %p4196_p6  ;;  %p4203_p8 = por %p4202_p0, %p4201_p5 }
  0xc5   : > { %p4204_p1 = pnand %p4203_p8, %p4197_p11 }
  0xc7   : > { %4207 = shalt.err (!%p4204_p1)
}
  0xc8   : > { %3878 = dma.hbm_to_vmem [thread:$0]  (%p5919_p2), %s5061_s16, 16, %s601_s21, %s4980_s22  }
  0xc9   : > { %s5922_s5 = sld [smem:[#allocation47_spill]]  ;;  %s610_s19 = scalar_lea.vmem [#allocation11], %s4978_s27 }
  0xca   : > { %s617_s14 = sshll.u32 %s610_s19, 4  ;;  %s5090_s23 = sshll.u32 %s4978_s27, 5  ;;  %s618_s14 = int_to_ptr.vmem [resolvable:$true] %s617_s14 }
  0xcf   : > { %s5086_s25 = scalar_lea.hbm %s5922_s5, %s5005_s29  ;;  %s4212_s24 = scalar_lea.hbm %s5922_s5, 32 }
  0xd0   : > { %s4208_s30 = scalar_lea.hbm %s5086_s25, 16  ;;  %p4213_p10 = scmp.lt.u32.totalorder %s5086_s25, %s5922_s5 }
  0xd1   : > { %p4209_p9 = scmp.ne.s32.totalorder %s5086_s25, %s4208_s30  ;;  %p4214_p13 = scmp.lt.u32.totalorder %s4212_s24, %s4208_s30 }
  0xd2   : > { %p4216_p4 = scmp.lt.u32.totalorder %s4208_s30, %s5086_s25 }
  0xd3   : > { %p4210_p3 = pnand %p4209_p9, %p5919_p2  ;;  %p4215_p7 = por %p4214_p13, %p4213_p10 }
  0xd5   : > { %p4211_p12 = pneg %p4210_p3  ;;  %p4217_p6 = por %p4216_p4, %p4215_p7 }
  0xd7   : > { %p4218_p11 = pnand %p4217_p6, %p4211_p12 }
  0xd9   : > { %4221 = shalt.err (!%p4218_p11)
}
  0xda   : > { %s4222_s0 = scalar_lea.vmem %s618_s14, 16  ;;  %s4681_s19 = smov [#allocation11]  }
  0xdb   : > { %p4223_p5 = scmp.ne.s32.totalorder %s618_s14, %s4222_s0  ;;  %s4226_s2 = sshll.u32 %s4681_s19, 4  ;;  %s4227_s2 = int_to_ptr.vmem [resolvable:$false] %s4226_s2 }
  0xdc   : > { %s4228_s16 = scalar_lea.vmem %s4227_s2, 32  ;;  %p4229_p1 = scmp.lt.s32.totalorder %s618_s14, %s4227_s2 }
  0xdd   : > { %p4224_p0 = pnand %p4223_p5, %p5919_p2  ;;  %p4230_p9 = scmp.lt.s32.totalorder %s4228_s16, %s4222_s0 }
  0xdf   : > { %p4225_p8 = pneg %p4224_p0  ;;  %p4231_p3 = por %p4230_p9, %p4229_p1 }
  0xe1   : > { %p4232_p10 = pnand %p4231_p3, %p4225_p8 }
  0xe3   : > { %4235 = shalt.err (!%p4232_p10)
}
  0xe4   : > { %3879 = dma.hbm_to_vmem [thread:$0]  (%p5919_p2), %s5086_s25, 16, %s618_s14, %s4980_s22  }
  0xe5   : > { %s5111_s30 = sshll.u32 %s4666_s18, 9  ;;  %s5923_s6 = sld [smem:[#allocation48_spill]] }
  0xe6   : > { %s628_s2 = scalar_lea.vmem [#allocation12], %s5090_s23 }
  0xe7   : > { %s635_s11 = sshll.u32 %s628_s2, 4  ;;  %s5120_s11 = int_to_ptr.vmem [resolvable:$true] %s635_s11 }
  0xeb   : > { %s5117_s13 = scalar_lea.hbm %s5923_s6, %s5111_s30  ;;  %s4240_s19 = scalar_lea.hbm %s5923_s6, 1024 }
  0xec   : > { %s4236_s0 = scalar_lea.hbm %s5117_s13, 512  ;;  %p4241_p4 = scmp.lt.u32.totalorder %s5117_s13, %s5923_s6 }
  0xed   : > { %p4237_p12 = scmp.ne.s32.totalorder %s5117_s13, %s4236_s0  ;;  %p4242_p6 = scmp.lt.u32.totalorder %s4240_s19, %s4236_s0 }
  0xee   : > { %p4244_p5 = scmp.lt.u32.totalorder %s4236_s0, %s5117_s13 }
  0xef   : > { %p4238_p13 = pnand %p4237_p12, %p5919_p2  ;;  %p4243_p11 = por %p4242_p6, %p4241_p4 }
  0xf1   : > { %p4239_p7 = pneg %p4238_p13  ;;  %p4245_p0 = por %p4244_p5, %p4243_p11 }
  0xf3   : > { %p4246_p8 = pnand %p4245_p0, %p4239_p7 }
  0xf5   : > { %4249 = shalt.err (!%p4246_p8)
}
  0xf6   : > { %s4250_s24 = scalar_lea.vmem %s5120_s11, 512  ;;  %s4682_s2 = smov [#allocation12]  }
  0xf7   : > { %p4251_p1 = scmp.ne.s32.totalorder %s5120_s11, %s4250_s24  ;;  %s4254_s25 = sshll.u32 %s4682_s2, 4  ;;  %s4255_s25 = int_to_ptr.vmem [resolvable:$false] %s4254_s25 }
  0xf8   : > { %s4256_s14 = scalar_lea.vmem %s4255_s25, 1024  ;;  %p4257_p10 = scmp.lt.s32.totalorder %s5120_s11, %s4255_s25 }
  0xf9   : > { %p4252_p9 = pnand %p4251_p1, %p5919_p2  ;;  %p4258_p12 = scmp.lt.s32.totalorder %s4256_s14, %s4250_s24 }
  0xfb   : > { %p4253_p3 = pneg %p4252_p9  ;;  %p4259_p13 = por %p4258_p12, %p4257_p10 }
  0xfd   : > { %p4260_p4 = pnand %p4259_p13, %p4253_p3 }
  0xff   : > { %4263 = shalt.err (!%p4260_p4)
}
 0x100   : > { %s5868_s0 = smov 128   ;;  %s5870_s19 = smov 8  }
 0x101   : > { %3880 = dma.hbm_to_vmem [thread:$0]  (%p5919_p2), %s5117_s13, 512, %s5120_s11, %s4980_s22, %s5868_s0, %s5868_s0, %s5870_s19  }
 0x102   : > { %s5924_s7 = sld [smem:[#allocation49_spill]]  ;;  %s649_s2 = scalar_lea.vmem [#allocation13], %s5090_s23 }
 0x103   : > { %s656_s25 = sshll.u32 %s649_s2, 4  ;;  %s5154_s25 = int_to_ptr.vmem [resolvable:$true] %s656_s25 }
 0x108   : > { %s5151_s24 = scalar_lea.hbm %s5924_s7, %s5111_s30  ;;  %s4268_s11 = scalar_lea.hbm %s5924_s7, 1024 }
 0x109   : > { %s4264_s14 = scalar_lea.hbm %s5151_s24, 512  ;;  %p4269_p5 = scmp.lt.u32.totalorder %s5151_s24, %s5924_s7 }
 0x10a   : > { %p4265_p7 = scmp.ne.s32.totalorder %s5151_s24, %s4264_s14  ;;  %p4270_p0 = scmp.lt.u32.totalorder %s4268_s11, %s4264_s14 }
 0x10b   : > { %p4272_p1 = scmp.lt.u32.totalorder %s4264_s14, %s5151_s24 }
 0x10c   : > { %p4266_p6 = pnand %p4265_p7, %p5919_p2  ;;  %p4271_p8 = por %p4270_p0, %p4269_p5 }
 0x10e   : > { %p4267_p11 = pneg %p4266_p6  ;;  %p4273_p9 = por %p4272_p1, %p4271_p8 }
 0x110   : > { %p4274_p3 = pnand %p4273_p9, %p4267_p11 }
 0x112   : > { %4277 = shalt.err (!%p4274_p3)
}
 0x113   : > { %s4278_s2 = scalar_lea.vmem %s5154_s25, 512  ;;  %s4685_s3 = smov [#allocation13]  }
 0x114   : > { %p4279_p10 = scmp.ne.s32.totalorder %s5154_s25, %s4278_s2  ;;  %s4282_s13 = sshll.u32 %s4685_s3, 4  ;;  %s4283_s13 = int_to_ptr.vmem [resolvable:$false] %s4282_s13 }
 0x115   : > { %s4284_s16 = scalar_lea.vmem %s4283_s13, 1024  ;;  %p4285_p4 = scmp.lt.s32.totalorder %s5154_s25, %s4283_s13 }
 0x116   : > { %p4280_p12 = pnand %p4279_p10, %p5919_p2  ;;  %p4286_p7 = scmp.lt.s32.totalorder %s4284_s16, %s4278_s2 }
 0x118   : > { %p4281_p13 = pneg %p4280_p12  ;;  %p4287_p6 = por %p4286_p7, %p4285_p4 }
 0x11a   : > { %p4288_p5 = pnand %p4287_p6, %p4281_p13 }
 0x11c   : > { %4291 = shalt.err (!%p4288_p5)
}
 0x11d   : > { %3881 = dma.hbm_to_vmem [thread:$0]  (%p5919_p2), %s5151_s24, 512, %s5154_s25, %s4980_s22, %s5868_s0, %s5868_s0, %s5870_s19  }
 0x11e   : > { %s5185_s21 = scalar_lea.hbm %s5826_s8, %s5005_s29  ;;  %s669_s2 = scalar_lea.vmem [#allocation14], %s4978_s27 }
 0x11f   : > { %s676_s3 = sshll.u32 %s669_s2, 4  ;;  %s4292_s13 = scalar_lea.hbm %s5185_s21, 16  ;;  %s677_s3 = int_to_ptr.vmem [resolvable:$true] %s676_s3 }
 0x120   : > { %p4293_p11 = scmp.ne.s32.totalorder %s5185_s21, %s4292_s13  ;;  %s4296_s24 = scalar_lea.hbm %s5826_s8, 32 }
 0x121   : > { %p4297_p1 = scmp.lt.u32.totalorder %s5185_s21, %s5826_s8  ;;  %p4298_p9 = scmp.lt.u32.totalorder %s4296_s24, %s4292_s13 }
 0x122   : > { %p4294_p0 = pnand %p4293_p11, %p5919_p2  ;;  %p4300_p10 = scmp.lt.u32.totalorder %s4292_s13, %s5185_s21 }
 0x123   : > { %p4299_p3 = por %p4298_p9, %p4297_p1 }
 0x124   : > { %p4295_p8 = pneg %p4294_p0 }
 0x125   : > { %p4301_p12 = por %p4300_p10, %p4299_p3 }
 0x127   : > { %p4302_p13 = pnand %p4301_p12, %p4295_p8 }
 0x129   : > { %4305 = shalt.err (!%p4302_p13)
}
 0x12a   : > { %s4306_s11 = scalar_lea.vmem %s677_s3, 16  ;;  %s4686_s2 = smov [#allocation14]  }
 0x12b   : > { %p4307_p4 = scmp.ne.s32.totalorder %s677_s3, %s4306_s11  ;;  %s4310_s0 = sshll.u32 %s4686_s2, 4  ;;  %s4311_s0 = int_to_ptr.vmem [resolvable:$false] %s4310_s0 }
 0x12c   : > { %s4312_s4 = scalar_lea.vmem %s4311_s0, 32  ;;  %p4313_p5 = scmp.lt.s32.totalorder %s677_s3, %s4311_s0 }
 0x12d   : > { %p4308_p7 = pnand %p4307_p4, %p5919_p2  ;;  %p4314_p11 = scmp.lt.s32.totalorder %s4312_s4, %s4306_s11 }
 0x12f   : > { %p4309_p6 = pneg %p4308_p7  ;;  %p4315_p0 = por %p4314_p11, %p4313_p5 }
 0x131   : > { %p4316_p1 = pnand %p4315_p0, %p4309_p6 }
 0x133   : > { %4319 = shalt.err (!%p4316_p1)
}
 0x134   : > { %3882 = dma.hbm_to_vmem [thread:$0]  (%p5919_p2), %s5185_s21, 16, %s677_s3, %s4980_s22  }
 0x135   : > { %s5210_s24 = scalar_lea.hbm %s5827_s9, %s5111_s30  ;;  %s687_s0 = scalar_lea.vmem [#allocation15], %s5090_s23 }
 0x136   : > { %s694_s25 = sshll.u32 %s687_s0, 4  ;;  %s4320_s14 = scalar_lea.hbm %s5210_s24, 512  ;;  %s5213_s25 = int_to_ptr.vmem [resolvable:$true] %s694_s25 }
 0x137   : > { %p4321_p8 = scmp.ne.s32.totalorder %s5210_s24, %s4320_s14  ;;  %s4324_s3 = scalar_lea.hbm %s5827_s9, 1024 }
 0x138   : > { %p4325_p10 = scmp.lt.u32.totalorder %s5210_s24, %s5827_s9  ;;  %p4326_p12 = scmp.lt.u32.totalorder %s4324_s3, %s4320_s14 }
 0x139   : > { %p4322_p9 = pnand %p4321_p8, %p5919_p2  ;;  %p4328_p4 = scmp.lt.u32.totalorder %s4320_s14, %s5210_s24 }
 0x13a   : > { %p4327_p13 = por %p4326_p12, %p4325_p10 }
 0x13b   : > { %p4323_p3 = pneg %p4322_p9 }
 0x13c   : > { %p4329_p7 = por %p4328_p4, %p4327_p13 }
 0x13e   : > { %p4330_p6 = pnand %p4329_p7, %p4323_p3 }
 0x140   : > { %4333 = shalt.err (!%p4330_p6)
}
 0x141   : > { %s4334_s13 = scalar_lea.vmem %s5213_s25, 512  ;;  %s4687_s16 = smov [#allocation15]  }
 0x142   : > { %p4335_p5 = scmp.ne.s32.totalorder %s5213_s25, %s4334_s13  ;;  %s4338_s0 = sshll.u32 %s4687_s16, 4  ;;  %s4339_s0 = int_to_ptr.vmem [resolvable:$false] %s4338_s0 }
 0x143   : > { %s4340_s11 = scalar_lea.vmem %s4339_s0, 1024  ;;  %p4341_p1 = scmp.lt.s32.totalorder %s5213_s25, %s4339_s0 }
 0x144   : > { %p4336_p11 = pnand %p4335_p5, %p5919_p2  ;;  %p4342_p8 = scmp.lt.s32.totalorder %s4340_s11, %s4334_s13 }
 0x146   : > { %p4337_p0 = pneg %p4336_p11  ;;  %p4343_p9 = por %p4342_p8, %p4341_p1 }
 0x148   : > { %p4344_p10 = pnand %p4343_p9, %p4337_p0 }
 0x14a   : > { %4347 = shalt.err (!%p4344_p10)
}
 0x14b   : > { %s5925_s14 = smov 128   ;;  %s5244_s2 = scalar_lea.hbm %s5828_s10, %s5111_s30 }
 0x14c   : > { %3883 = dma.hbm_to_vmem [thread:$0]  (%p5919_p2), %s5210_s24, 512, %s5213_s25, %s4980_s22, %s5925_s14, %s5925_s14, %s5870_s19  }
 0x14d   : > { %s708_s4 = scalar_lea.vmem [#allocation16], %s5090_s23  ;;  %s4348_s16 = scalar_lea.hbm %s5244_s2, 512 }
 0x14e   : > { %s715_s13 = sshll.u32 %s708_s4, 4  ;;  %p4349_p3 = scmp.ne.s32.totalorder %s5244_s2, %s4348_s16  ;;  %s5247_s13 = int_to_ptr.vmem [resolvable:$true] %s715_s13 }
 0x14f   : > { %s4352_s25 = scalar_lea.hbm %s5828_s10, 1024  ;;  %p4353_p4 = scmp.lt.u32.totalorder %s5244_s2, %s5828_s10 }
 0x150   : > { %p4350_p12 = pnand %p4349_p3, %p5919_p2  ;;  %p4354_p7 = scmp.lt.u32.totalorder %s4352_s25, %s4348_s16 }
 0x151   : > { %p4356_p5 = scmp.lt.u32.totalorder %s4348_s16, %s5244_s2 }
 0x152   : > { %p4351_p13 = pneg %p4350_p12  ;;  %p4355_p6 = por %p4354_p7, %p4353_p4 }
 0x154   : > { %p4357_p11 = por %p4356_p5, %p4355_p6 }
 0x156   : > { %p4358_p0 = pnand %p4357_p11, %p4351_p13 }
 0x158   : > { %4361 = shalt.err (!%p4358_p0)
}
 0x159   : > { %s4362_s3 = scalar_lea.vmem %s5247_s13, 512  ;;  %s4688_s4 = smov [#allocation16]  }
 0x15a   : > { %p4363_p1 = scmp.ne.s32.totalorder %s5247_s13, %s4362_s3  ;;  %s4366_s0 = sshll.u32 %s4688_s4, 4  ;;  %s4367_s0 = int_to_ptr.vmem [resolvable:$false] %s4366_s0 }
 0x15b   : > { %s4368_s24 = scalar_lea.vmem %s4367_s0, 1024  ;;  %p4369_p10 = scmp.lt.s32.totalorder %s5247_s13, %s4367_s0 }
 0x15c   : > { %p4364_p8 = pnand %p4363_p1, %p5919_p2  ;;  %p4370_p3 = scmp.lt.s32.totalorder %s4368_s24, %s4362_s3 }
 0x15e   : > { %p4365_p9 = pneg %p4364_p8  ;;  %p4371_p12 = por %p4370_p3, %p4369_p10 }
 0x160   : > { %p4372_p4 = pnand %p4371_p12, %p4365_p9 }
 0x162   : > { %4375 = shalt.err (!%p4372_p4)
}
 0x163   : > { %3884 = dma.hbm_to_vmem [thread:$0]  (%p5919_p2), %s5244_s2, 512, %s5247_s13, %s4980_s22, %s5925_s14, %s5925_s14, %s5870_s19  }
 0x164   : > { %s5926_s11 = sld [smem:[#allocation50_spill]]  ;;  %s729_s3 = scalar_lea.vmem [#allocation17], %s5090_s23 }
 0x165   : > { %s736_s4 = sshll.u32 %s729_s3, 4  ;;  %s5281_s4 = int_to_ptr.vmem [resolvable:$true] %s736_s4 }
 0x16a   : > { %s5278_s21 = scalar_lea.hbm %s5926_s11, %s5111_s30  ;;  %s4380_s13 = scalar_lea.hbm %s5926_s11, 1024 }
 0x16b   : > { %s4376_s0 = scalar_lea.hbm %s5278_s21, 512  ;;  %p4381_p5 = scmp.lt.u32.totalorder %s5278_s21, %s5926_s11 }
 0x16c   : > { %p4377_p13 = scmp.ne.s32.totalorder %s5278_s21, %s4376_s0  ;;  %p4382_p11 = scmp.lt.u32.totalorder %s4380_s13, %s4376_s0 }
 0x16d   : > { %p4384_p1 = scmp.lt.u32.totalorder %s4376_s0, %s5278_s21 }
 0x16e   : > { %p4378_p7 = pnand %p4377_p13, %p5919_p2  ;;  %p4383_p0 = por %p4382_p11, %p4381_p5 }
 0x170   : > { %p4379_p6 = pneg %p4378_p7  ;;  %p4385_p8 = por %p4384_p1, %p4383_p0 }
 0x172   : > { %p4386_p9 = pnand %p4385_p8, %p4379_p6 }
 0x174   : > { %4389 = shalt.err (!%p4386_p9)
}
 0x175   : > { %s4390_s3 = scalar_lea.vmem %s5281_s4, 512  ;;  %s4689_s24 = smov [#allocation17]  }
 0x176   : > { %p4391_p10 = scmp.ne.s32.totalorder %s5281_s4, %s4390_s3  ;;  %s4394_s2 = sshll.u32 %s4689_s24, 4  ;;  %s4395_s2 = int_to_ptr.vmem [resolvable:$false] %s4394_s2 }
 0x177   : > { %s4396_s16 = scalar_lea.vmem %s4395_s2, 1024  ;;  %p4397_p4 = scmp.lt.s32.totalorder %s5281_s4, %s4395_s2 }
 0x178   : > { %p4392_p3 = pnand %p4391_p10, %p5919_p2  ;;  %p4398_p13 = scmp.lt.s32.totalorder %s4396_s16, %s4390_s3 }
 0x17a   : > { %p4393_p12 = pneg %p4392_p3  ;;  %p4399_p7 = por %p4398_p13, %p4397_p4 }
 0x17c   : > { %p4400_p5 = pnand %p4399_p7, %p4393_p12 }
 0x17e   : > { %4403 = shalt.err (!%p4400_p5)
}
 0x17f   : > { %3885 = dma.hbm_to_vmem [thread:$0]  (%p5919_p2), %s5278_s21, 512, %s5281_s4, %s4980_s22, %s5925_s14, %s5925_s14, %s5870_s19  }
 0x180   : > { %s5927_s25 = sld [smem:[#allocation51_spill]]  ;;  %s749_s3 = scalar_lea.vmem [#allocation18], %s4978_s27 }
 0x181   : > { %s756_s2 = sshll.u32 %s749_s3, 4  ;;  %s757_s2 = int_to_ptr.vmem [resolvable:$true] %s756_s2 }
 0x186   : > { %s5928_s5 = smov %s5927_s25  ;;  %s5312_s24 = scalar_lea.hbm %s5927_s25, %s5005_s29 }
 0x187   : > { %s4404_s16 = scalar_lea.hbm %s5312_s24, 16  ;;  %s4408_s21 = scalar_lea.hbm %s5928_s5, 32 }
 0x188   : > { %p4405_p6 = scmp.ne.s32.totalorder %s5312_s24, %s4404_s16  ;;  %p4409_p1 = scmp.lt.u32.totalorder %s5312_s24, %s5928_s5 }
 0x189   : > { %p4410_p8 = scmp.lt.u32.totalorder %s4408_s21, %s4404_s16  ;;  %p4412_p10 = scmp.lt.u32.totalorder %s4404_s16, %s5312_s24 }
 0x18a   : > { %p4406_p11 = pnand %p4405_p6, %p5919_p2 }
 0x18b   : > { %p4411_p9 = por %p4410_p8, %p4409_p1 }
 0x18c   : > { %p4407_p0 = pneg %p4406_p11 }
 0x18d   : > { %p4413_p3 = por %p4412_p10, %p4411_p9 }
 0x18f   : > { %p4414_p12 = pnand %p4413_p3, %p4407_p0 }
 0x191   : > { %4417 = shalt.err (!%p4414_p12)
}
 0x192   : > { %s4418_s13 = scalar_lea.vmem %s757_s2, 16  ;;  %s4690_s25 = smov [#allocation18]  }
 0x193   : > { %p4419_p4 = scmp.ne.s32.totalorder %s757_s2, %s4418_s13  ;;  %s4422_s3 = sshll.u32 %s4690_s25, 4  ;;  %s4423_s3 = int_to_ptr.vmem [resolvable:$false] %s4422_s3 }
 0x194   : > { %s4424_s6 = scalar_lea.vmem %s4423_s3, 32  ;;  %p4425_p5 = scmp.lt.s32.totalorder %s757_s2, %s4423_s3 }
 0x195   : > { %p4420_p13 = pnand %p4419_p4, %p5919_p2  ;;  %p4426_p6 = scmp.lt.s32.totalorder %s4424_s6, %s4418_s13 }
 0x197   : > { %p4421_p7 = pneg %p4420_p13  ;;  %p4427_p11 = por %p4426_p6, %p4425_p5 }
 0x199   : > { %p4428_p1 = pnand %p4427_p11, %p4421_p7 }
 0x19b   : > { %4431 = shalt.err (!%p4428_p1)
}
 0x19c   : > { %3886 = dma.hbm_to_vmem [thread:$0]  (%p5919_p2), %s5312_s24, 16, %s757_s2, %s4980_s22  }
 0x19d   : > { %s5929_s21 = sld [smem:[#allocation52_spill]]  ;;  %s767_s0 = scalar_lea.vmem [#allocation19], %s5090_s23 }
 0x19e   : > { %s774_s13 = sshll.u32 %s767_s0, 4  ;;  %s5340_s13 = int_to_ptr.vmem [resolvable:$true] %s774_s13 }
 0x1a3   : > { %s5337_s4 = scalar_lea.hbm %s5929_s21, %s5111_s30  ;;  %s4436_s2 = scalar_lea.hbm %s5929_s21, 1024 }
 0x1a4   : > { %s4432_s25 = scalar_lea.hbm %s5337_s4, 512  ;;  %p4437_p10 = scmp.lt.u32.totalorder %s5337_s4, %s5929_s21 }
 0x1a5   : > { %p4433_p0 = scmp.ne.s32.totalorder %s5337_s4, %s4432_s25  ;;  %p4438_p3 = scmp.lt.u32.totalorder %s4436_s2, %s4432_s25 }
 0x1a6   : > { %p4440_p4 = scmp.lt.u32.totalorder %s4432_s25, %s5337_s4 }
 0x1a7   : > { %p4434_p8 = pnand %p4433_p0, %p5919_p2  ;;  %p4439_p12 = por %p4438_p3, %p4437_p10 }
 0x1a9   : > { %p4435_p9 = pneg %p4434_p8  ;;  %p4441_p13 = por %p4440_p4, %p4439_p12 }
 0x1ab   : > { %p4442_p7 = pnand %p4441_p13, %p4435_p9 }
 0x1ad   : > { %4445 = shalt.err (!%p4442_p7)
}
 0x1ae   : > { %s4446_s23 = scalar_lea.vmem %s5340_s13, 512  ;;  %s4691_s7 = smov [#allocation19]  }
 0x1af   : > { %p4447_p5 = scmp.ne.s32.totalorder %s5340_s13, %s4446_s23  ;;  %s4450_s16 = sshll.u32 %s4691_s7, 4  ;;  %s4451_s16 = int_to_ptr.vmem [resolvable:$false] %s4450_s16 }
 0x1b0   : > { %s4452_s0 = scalar_lea.vmem %s4451_s16, 1024  ;;  %p4453_p1 = scmp.lt.s32.totalorder %s5340_s13, %s4451_s16 }
 0x1b1   : > { %p4448_p6 = pnand %p4447_p5, %p5919_p2  ;;  %p4454_p0 = scmp.lt.s32.totalorder %s4452_s0, %s4446_s23 }
 0x1b3   : > { %p4449_p11 = pneg %p4448_p6  ;;  %p4455_p8 = por %p4454_p0, %p4453_p1 }
 0x1b5   : > { %p4456_p10 = pnand %p4455_p8, %p4449_p11 }
 0x1b7   : > { %4459 = shalt.err (!%p4456_p10)
}
 0x1b8   : > { %3887 = dma.hbm_to_vmem [thread:$0]  (%p5919_p2), %s5337_s4, 512, %s5340_s13, %s4980_s22, %s5925_s14, %s5925_s14, %s5870_s19  }
 0x1b9   : > { %s5930_s24 = sld [smem:[#allocation53_spill]]  ;;  %s787_s30 = scalar_lea.vmem [#allocation20], %s4978_s27 }
 0x1ba   : > { %s794_s23 = sshll.u32 %s787_s30, 4  ;;  %s3523_s7 = sshll.u32 %s4978_s27, 6  ;;  %s795_s23 = int_to_ptr.vmem [resolvable:$true] %s794_s23 }
 0x1bf   : > { %s5931_s2 = smov %s5930_s24  ;;  %s5371_s6 = scalar_lea.hbm %s5930_s24, %s5005_s29 }
 0x1c0   : > { %s4460_s16 = scalar_lea.hbm %s5371_s6, 16  ;;  %s4464_s13 = scalar_lea.hbm %s5931_s2, 32 }
 0x1c1   : > { %p4461_p9 = scmp.ne.s32.totalorder %s5371_s6, %s4460_s16  ;;  %p4465_p4 = scmp.lt.u32.totalorder %s5371_s6, %s5931_s2 }
 0x1c2   : > { %p4466_p13 = scmp.lt.u32.totalorder %s4464_s13, %s4460_s16  ;;  %p4468_p5 = scmp.lt.u32.totalorder %s4460_s16, %s5371_s6 }
 0x1c3   : > { %p4462_p3 = pnand %p4461_p9, %p5919_p2 }
 0x1c4   : > { %p4467_p7 = por %p4466_p13, %p4465_p4 }
 0x1c5   : > { %p4463_p12 = pneg %p4462_p3 }
 0x1c6   : > { %p4469_p6 = por %p4468_p5, %p4467_p7 }
 0x1c8   : > { %p4470_p11 = pnand %p4469_p6, %p4463_p12 }
 0x1ca   : > { %4473 = shalt.err (!%p4470_p11)
}
 0x1cb   : > { %s4474_s24 = scalar_lea.vmem %s795_s23, 16  ;;  %s4692_s30 = smov [#allocation20]  }
 0x1cc   : > { %p4475_p1 = scmp.ne.s32.totalorder %s795_s23, %s4474_s24  ;;  %s4478_s19 = sshll.u32 %s4692_s30, 4  ;;  %s4479_s19 = int_to_ptr.vmem [resolvable:$false] %s4478_s19 }
 0x1cd   : > { %s4480_s0 = scalar_lea.vmem %s4479_s19, 32  ;;  %p4481_p10 = scmp.lt.s32.totalorder %s795_s23, %s4479_s19 }
 0x1ce   : > { %p4476_p0 = pnand %p4475_p1, %p5919_p2  ;;  %p4482_p9 = scmp.lt.s32.totalorder %s4480_s0, %s4474_s24 }
 0x1d0   : > { %p4477_p8 = pneg %p4476_p0  ;;  %p4483_p3 = por %p4482_p9, %p4481_p10 }
 0x1d2   : > { %p4484_p4 = pnand %p4483_p3, %p4477_p8 }
 0x1d4   : > { %4487 = shalt.err (!%p4484_p4)
}
 0x1d5   : > { %3888 = dma.hbm_to_vmem [thread:$0]  (%p5919_p2), %s5371_s6, 16, %s795_s23, %s4980_s22  }
 0x1d6   : > { %s3588_s16 = sshll.u32 %s4666_s18, 10  ;;  %s5932_s25 = sld [smem:[#allocation54_spill]] }
 0x1d7   : > { %s805_s19 = scalar_lea.vmem [#allocation21], %s3523_s7 }
 0x1d8   : > { %s812_s24 = sshll.u32 %s805_s19, 4  ;;  %s5401_s24 = int_to_ptr.vmem [resolvable:$true] %s812_s24 }
 0x1dc   : > { %s5933_s3 = smov %s5932_s25  ;;  %s5397_s30 = scalar_lea.hbm %s5932_s25, %s3588_s16 }
 0x1dd   : > { %s4488_s0 = scalar_lea.hbm %s5397_s30, 1024  ;;  %s4492_s4 = scalar_lea.hbm %s5933_s3, 2048 }
 0x1de   : > { %p4489_p12 = scmp.ne.s32.totalorder %s5397_s30, %s4488_s0  ;;  %p4493_p5 = scmp.lt.u32.totalorder %s5397_s30, %s5933_s3 }
 0x1df   : > { %p4494_p6 = scmp.lt.u32.totalorder %s4492_s4, %s4488_s0  ;;  %p4496_p1 = scmp.lt.u32.totalorder %s4488_s0, %s5397_s30 }
 0x1e0   : > { %p4490_p13 = pnand %p4489_p12, %p5919_p2 }
 0x1e1   : > { %p4495_p11 = por %p4494_p6, %p4493_p5 }
 0x1e2   : > { %p4491_p7 = pneg %p4490_p13 }
 0x1e3   : > { %p4497_p0 = por %p4496_p1, %p4495_p11 }
 0x1e5   : > { %p4498_p8 = pnand %p4497_p0, %p4491_p7 }
 0x1e7   : > { %4501 = shalt.err (!%p4498_p8)
}
 0x1e8   : > { %s4502_s7 = scalar_lea.vmem %s5401_s24, 1024  ;;  %s4693_s25 = smov [#allocation21]  }
 0x1e9   : > { %p4503_p10 = scmp.ne.s32.totalorder %s5401_s24, %s4502_s7  ;;  %s4506_s19 = sshll.u32 %s4693_s25, 4  ;;  %s4507_s19 = int_to_ptr.vmem [resolvable:$false] %s4506_s19 }
 0x1ea   : > { %s4508_s6 = scalar_lea.vmem %s4507_s19, 2048  ;;  %p4509_p4 = scmp.lt.s32.totalorder %s5401_s24, %s4507_s19 }
 0x1eb   : > { %p4504_p9 = pnand %p4503_p10, %p5919_p2  ;;  %p4510_p12 = scmp.lt.s32.totalorder %s4508_s6, %s4502_s7 }
 0x1ed   : > { %p4505_p3 = pneg %p4504_p9  ;;  %p4511_p13 = por %p4510_p12, %p4509_p4 }
 0x1ef   : > { %p4512_p5 = pnand %p4511_p13, %p4505_p3 }
 0x1f1   : > { %4515 = shalt.err (!%p4512_p5)
}
 0x1f2   : > { %s5934_s0 = smov 8   ;;  %s5935_s16 = sld [smem:[#allocation55_spill]] }
 0x1f3   : > { %3889 = dma.hbm_to_vmem [thread:$0]  (%p5919_p2), %s5397_s30, 1024, %s5401_s24, %s4980_s22, %s5925_s14, %s5925_s14, %s5934_s0  }
 0x1f4   : > { %s825_s7 = scalar_lea.vmem [#allocation22], %s4978_s27 }
 0x1f5   : > { %s832_s25 = sshll.u32 %s825_s7, 4  ;;  %s833_s25 = int_to_ptr.vmem [resolvable:$true] %s832_s25 }
 0x1f8   : > { %s5432_s13 = scalar_lea.hbm %s5935_s16, %s5005_s29  ;;  %s4520_s14 = scalar_lea.hbm %s5935_s16, 32 }
 0x1f9   : > { %s4516_s19 = scalar_lea.hbm %s5432_s13, 16  ;;  %p4521_p1 = scmp.lt.u32.totalorder %s5432_s13, %s5935_s16 }
 0x1fa   : > { %p4517_p7 = scmp.ne.s32.totalorder %s5432_s13, %s4516_s19  ;;  %p4522_p0 = scmp.lt.u32.totalorder %s4520_s14, %s4516_s19 }
 0x1fb   : > { %p4524_p10 = scmp.lt.u32.totalorder %s4516_s19, %s5432_s13 }
 0x1fc   : > { %p4518_p6 = pnand %p4517_p7, %p5919_p2  ;;  %p4523_p8 = por %p4522_p0, %p4521_p1 }
 0x1fe   : > { %p4519_p11 = pneg %p4518_p6  ;;  %p4525_p9 = por %p4524_p10, %p4523_p8 }
 0x200   : > { %p4526_p3 = pnand %p4525_p9, %p4519_p11 }
 0x202   : > { %4529 = shalt.err (!%p4526_p3)
}
 0x203   : > { %s4530_s27 = scalar_lea.vmem %s833_s25, 16  ;;  %s4694_s29 = smov [#allocation22]  }
 0x204   : > { %p4531_p4 = scmp.ne.s32.totalorder %s833_s25, %s4530_s27  ;;  %s4534_s0 = sshll.u32 %s4694_s29, 4  ;;  %s4535_s0 = int_to_ptr.vmem [resolvable:$false] %s4534_s0 }
 0x205   : > { %s4536_s2 = scalar_lea.vmem %s4535_s0, 32  ;;  %p4537_p5 = scmp.lt.s32.totalorder %s833_s25, %s4535_s0 }
 0x206   : > { %p4532_p12 = pnand %p4531_p4, %p5919_p2  ;;  %p4538_p7 = scmp.lt.s32.totalorder %s4536_s2, %s4530_s27 }
 0x208   : > { %p4533_p13 = pneg %p4532_p12  ;;  %p4539_p6 = por %p4538_p7, %p4537_p5 }
 0x20a   : > { %p4540_p0 = pnand %p4539_p6, %p4533_p13 }
 0x20c   : > { %4543 = shalt.err (!%p4540_p0)
}
 0x20d   : > { %3890 = dma.hbm_to_vmem [thread:$0]  (%p5919_p2), %s5432_s13, 16, %s833_s25, %s4980_s22  }
 0x20e PF: > { %p5936_p11 = scmp.ne.s32.totalorder %s5913_s17, 0 }
 0x20f   : > { %s5937_s23 = sld [smem:[#allocation36_spill]] (!%p5936_p11)  ;;  %s843_s4 = sand.u32 (!%p5936_p11), 1, %s4859_s20  }
 0x210   : > { %841 = sbr.rel (%p5936_p11) target bundleno = 4443 (0x115b), region = 88  ;;  %s5872_s7 = sand.u32 (!%p5936_p11), 1, %s4650_s28  }
 0x211   : > { %s5459_s19 = sshll.u32 (!%p5936_p11), %s5872_s7, 3  ;;  %s844_s6 = scalar_lea.sflag (!%p5936_p11), [#allocation4], %s843_s4 }
 0x212   : > { %s5873_s14 = scalar_lea.vmem (!%p5936_p11), [#allocation3], %s5459_s19 }
 0x215   : > { %p5938_p1 = scmp.ne.s32.totalorder (!%p5936_p11), %s5937_s23, 0 }
 0x217   : > { %4617 = dma.done.wait (%p5938_p1), %s844_s6, 128  }
 0x218   : > { %4619 = vsyncadd (%p5938_p1), %s844_s6, 4294967168  ;;  %p5939_p2 = scmp.eq.s32.totalorder %s4859_s20, 0 }
 0x21a   : > { %4621 = dma.done.wait (%p5939_p2), [#allocation7], 128   ;;  %p5940_p8 = pmov %p5939_p2 }
 0x21b   : > { %s5941_s12 = sld [smem:[#allocation28_spill]]  ;;  %s5942_s22 = sld [smem:[#allocation39_spill]] }
 0x21c   : > { %4623 = vsyncadd (%p5940_p8), [#allocation7], 4294967168 }
 0x221   : > { %s5471_s17 = sand.u32 1, %s5941_s12   ;;  %p5943_p10 = scmp.ne.s32.totalorder %s5942_s22, 0 }
 0x223   : > { %4625 = dma.done.wait (%p5943_p10), %s844_s6, 4224  }
 0x224   : > { %4627 = vsyncadd (%p5943_p10), %s844_s6, 4294963072  ;;  %s3530_s20 = sshll.u32 %s5471_s17, 5  ;;  %s3536_s25 = sshll.u32 %s5471_s17, 6 }
 0x225   : > { %s5483_s29 = scalar_lea.vmem [#allocation12], %s3530_s20  ;;  %s5485_s0 = scalar_lea.vmem [#allocation13], %s3530_s20 }
 0x226   : > { %s5488_s23 = scalar_lea.vmem [#allocation15], %s3530_s20  ;;  %s5490_s4 = scalar_lea.vmem [#allocation16], %s3530_s20 }
 0x227   : > { %s5492_s6 = scalar_lea.vmem [#allocation17], %s3530_s20  ;;  %s5495_s22 = scalar_lea.vmem [#allocation19], %s3530_s20 }
 0x228   : > { %s5498_s13 = scalar_lea.vmem [#allocation21], %s3536_s25  ;;  %s5502_s24 = scalar_lea.vmem [#allocation23], %s5459_s19 }
 0x229   : > { %s5944_s27 = sld [smem:[#allocation31_spill]] }
 0x22f   : > { %p3538_p9 = scmp.ne.s32.totalorder %s5944_s27, 0 }
 0x230   : > { %vm1101_vm0 = vcmask (!%p3538_p9), 261120   ;;  %v1103_v0 = vld [vmem:[%s5873_s14] sm:$0xff] (!%p3538_p9)  ;;  %v1100_v1 = vld [vmem:[#allocation6] sm:$0xff] (!%p3538_p9) }
 0x231   : > { %1099 = sbr.rel (%p3538_p9) target bundleno = 871 (0x367), region = 160  ;;  %v1104_v2 = vsel (!%p3538_p9), %vm1101_vm0, %v1103_v0, 0.0  ;;  %1102 = vst.msk [vmem:[%s5502_s24] sm:$0xff] (!%p3538_p9), %vm1101_vm0, %v1100_v1 }
 0x232   : > { %1105 = vadd.xlane.f32.xlu0 (!%p3538_p9), %v1104_v2 }
 0x2bf   : > { %v1106_v3 = vpop.xlane.xlu0 %1105 }
 0x2c0   : > { %v1108_v4 = vmul.f32 0.03125, %v1106_v3 }
 0x2c2   : > { %v1109_v5 = vsub.f32 %v1103_v0, %v1108_v4 }
 0x2c4   : > { %v1110_v6 = vmul.f32 %v1109_v5, %v1109_v5 }
 0x2c6   : > { %v1111_v7 = vsel %vm1101_vm0, %v1110_v6, 0.0 }
 0x2c7   : > { %1112 = vadd.xlane.f32.xlu0 %v1111_v7 }
 0x354   : > { %v1113_v8 = vpop.xlane.xlu0 %1112 }
 0x355   : > { %v1114_v9 = vmul.f32 0.03125, %v1113_v8 }
 0x357   : > { %v1115_v10 = vadd.f32 1e-05, %v1114_v9 }
 0x359   : > { %4030 = vrsqrt.f32 %v1115_v10 }
 0x363   : > { %v4031_v11 = vpop.eup %4030 }
 0x364   : > { %v1117_v12 = vmul.f32 %v4031_v11, %v1109_v5 }
 0x366   : > { %1118 = vst.msk [vmem:[#allocation2] sm:$0xff] %vm1101_vm0, %v1117_v12 }
 0x367 PF: > { %v5513_v13 = vld [vmem:[%s5502_s24] sm:$0xff]  ;;  %vm1125_vm1 = vcmask 261120   ;;  %v1154_v20 = vld [vmem:[%s5483_s29] sm:$0xff]  ;;  %v4695_v23 = vmov 0.0|0.0   ;;  %v1157_v25 = vld [vmem:[%s5483_s29 + $0x18] sm:$0xff]  ;;  %vm4696_vm2 = vmmov 0  }
 0x368   : > { %v1126_v14 = vsel %vm1125_vm1, %v5513_v13, 0.0  ;;  %v1155_v21 = vld [vmem:[%s5483_s29 + $0x8] sm:$0xff]  ;;  %v1156_v22 = vld [vmem:[%s5483_s29 + $0x10] sm:$0xff]  ;;  %3825 = vmatprep.subr.bf16.mxu1 %v4695_v23  ;;  %v4697_v26 = vmov 0.0   ;;  %s5945_s20 = scalar_lea.vmem [#allocation8], %s5471_s17  ;;  %s5946_s25 = scalar_lea.vmem [#allocation9], %s5471_s17 }
 0x369   : > { %1127 = vadd.xlane.f32.xlu0 %v1126_v14  ;;  %v3826_v24 = vpack.c.bf16 %v1155_v21, %v1154_v20  ;;  %3668 = vmatprep.mubr.msk.f32.mxu1 %vm4696_vm2, %v4697_v26  ;;  %v3829_v27 = vpack.c.bf16 %v1157_v25, %v1156_v22  ;;  %v5533_v32 = vld [vmem:[%s5945_s20] ss:$0 sm:$0xff]  ;;  %s4698_s27 = smov 120   ;;  %s4699_s29 = smov 96   ;;  %vm1234_vm3 = vcmask 64512   ;;  %vm1904_vm4 = vcmask 130048  }
 0x36a   : > { %3681 = vmatprep.subr.mxu0 %v4697_v26  ;;  %3683 = vmatprep.mubr.msk.f32.mxu0 %vm4696_vm2, %v4697_v26  ;;  %v5537_v34 = vld [vmem:[%s5946_s25] ss:$0 sm:$0xff]  ;;  %s4700_s20 = smov 88   ;;  %s4701_s25 = smov 80   ;;  %vm1906_vm5 = vcmask 195584   ;;  %vm3034_vm6 = vcmask 523264  }
 0x36b   : > { %3827 = vmatpush3.bf16.msra.mxu1 %v3826_v24  ;;  %s4702_s30 = smov 112   ;;  %s4703_s7 = smov 72  }
 0x36c   : > { %3828 = vmatprep.subr.bf16.mxu1 %v4695_v23  ;;  %s5874_s14 = smov 104   ;;  %s4705_s12 = smov 64  }
 0x36d   : > { %s4707_s2 = smov 40  }
 0x36f   : > { %3830 = vmatpush3.bf16.msra.mxu1 %v3829_v27 }
 0x370   : > { %3671 = vmatprep.subr.mxu1 %v4697_v26 }
 0x3f6   : > { %v1128_v15 = vpop.xlane.xlu0 %1127 }
 0x3f7   : > { %v1130_v16 = vmul.f32 0.03125, %v1128_v15 }
 0x3f9   : > { %v1131_v17 = vsub.f32 %v5513_v13, %v1130_v16 }
 0x3fb   : > { %v1132_v18 = vmul.f32 %v1131_v17, %v1131_v17 }
 0x3fd   : > { %v1133_v19 = vsel %vm1125_vm1, %v1132_v18, 0.0 }
 0x3fe   : > { %1134 = vadd.xlane.f32.xlu0 %v1133_v19 }
 0x48b   : > { %v1135_v28 = vpop.xlane.xlu0 %1134 }
 0x48c   : > { %v1136_v29 = vmul.f32 0.03125, %v1135_v28 }
 0x48e   : > { %v1137_v30 = vadd.f32 1e-05, %v1136_v29 }
 0x490   : > { %4032 = vrsqrt.f32 %v1137_v30  ;;  %v1996_v30 = vld [vmem:[%s5488_s23] sm:$0xff] }
 0x49a   : > { %v4033_v31 = vpop.eup %4032 }
 0x49b   : > { %v1139_v33 = vmul.f32 %v4033_v31, %v1131_v17  ;;  %v1997_v31 = vld [vmem:[%s5488_s23 + $0x8] sm:$0xff] }
 0x49d   : > { %v1146_v35 = vmul.f32 %v5533_v32, %v1139_v33 }
 0x49f   : > { %v1153_v36 = vadd.f32 %v5537_v34, %v1146_v35 }
 0x4a1   : > { %3669 = vmatmul.mubr.msk.f32.vlgmr.msra.gmra.mrb[0].mxu1 %vm1125_vm1, %v1153_v36  ;;  %v1993_v36 = vld [vmem:[#allocation2] sm:$0xff] }
 0x4a2   : > { %3673 = vmatprep.mubr.msk.f32.mxu1 %vm4696_vm2, %v4697_v26 }
 0x574   : > { %v5544_v37 = vpop.f32.mrb[0].mxu1 }
 0x575   : > { %1396 = vrot.lane.b32.xlu0 %v5544_v37, %s4698_s27  ;;  %1232 = vrot.lane.b32.xlu1 %v5544_v37, %s4699_s29  ;;  %v3670_v38 = vpop.f32.mrb[1].mxu1 }
 0x579   : > { %1398 = vrot.lane.b32.xlu1 %v5544_v37, %s4700_s20 }
 0x57d   : > { %1563 = vrot.lane.b32.xlu1 %v5544_v37, %s4701_s25 }
 0x581   : > { %1561 = vrot.lane.b32.xlu1 %v5544_v37, %s4702_s30 }
 0x585   : > { %1728 = vrot.lane.b32.xlu1 %v5544_v37, %s4703_s7 }
 0x589   : > { %1726 = vrot.lane.b32.xlu1 %v5544_v37, %s5874_s14  ;;  %s4708_s14 = smov 56  }
 0x5e7   : > { %v1233_v39 = vpop.permute.xlu1 %1232  ;;  %v1397_v41 = vpop.permute.xlu0 %1396 }
 0x5e8   : > { %3672 = vmatpush3.xpose.msk.msra.mxu1 %vm1234_vm3, %v1233_v39  ;;  %v1998_v39 = vld [vmem:[%s5488_s23 + $0x10] sm:$0xff] }
 0x5e9   : > { %3676 = vmatprep.subr.mxu1 %v4697_v26 }
 0x5eb   : > { %3674 = vmatmul.mubr.msk.f32.vlgmr.msra.gmra.mrb[2].mxu1 %vm1234_vm3, %v5544_v37  ;;  %v1399_v40 = vpop.permute.xlu1 %1398 }
 0x5ec   : > { %3682 = vmatpush3.xpose.msk.msra.mxu0 %vm1234_vm3, %v1399_v40  ;;  %3678 = vmatprep.mubr.msk.f32.mxu1 %vm4696_vm2, %v4697_v26  ;;  %v1999_v40 = vld [vmem:[%s5488_s23 + $0x18] sm:$0xff]  ;;  %s4711_s23 = smov 24  }
 0x5ed   : > { %3691 = vmatprep.subr.mxu0 %v4697_v26 }
 0x5ef   : > { %3684 = vmatmul.mubr.msk.f32.vlgmr.msra.gmra.mrb[0].mxu0 %vm1234_vm3, %v1397_v41  ;;  %v1564_v42 = vpop.permute.xlu1 %1563  ;;  %v1994_v41 = vmul.f32 %v5533_v32, %v1993_v36  ;;  %v1908_v32 = vld [vmem:[%s5485_s0] sm:$0xff] }
 0x5f0   : > { %3692 = vmatpush3.xpose.msk.msra.mxu0 %vm1234_vm3, %v1564_v42  ;;  %3693 = vmatprep.mubr.msk.f32.mxu0 %vm4696_vm2, %v4697_v26  ;;  %v3841_v42 = vpack.c.bf16 %v1999_v40, %v1998_v39 }
 0x5f1   : > { %3701 = vmatprep.subr.mxu0 %v4697_v26 }
 0x5f3   : > { %v1562_v43 = vpop.permute.xlu1 %1561 }
 0x5f4   : > { %3694 = vmatmul.mubr.msk.f32.vlgmr.msra.gmra.mrb[2].mxu0 %vm1234_vm3, %v1562_v43  ;;  %v1995_v43 = vadd.f32 %v5537_v34, %v1994_v41 }
 0x5f5   : > { %3703 = vmatprep.mubr.msk.f32.mxu0 %vm4696_vm2, %v4697_v26 }
 0x5f7   : > { %v1729_v44 = vpop.permute.xlu1 %1728 }
 0x5f8   : > { %3702 = vmatpush3.xpose.msk.msra.mxu0 %vm1234_vm3, %v1729_v44  ;;  %v1909_v44 = vld [vmem:[%s5485_s0 + $0x8] sm:$0xff] }
 0x5f9   : > { %3831 = vmatprep.subr.bf16.mxu0 %v4695_v23 }
 0x5fb   : > { %v1727_v45 = vpop.permute.xlu1 %1726 }
 0x5fc   : > { %3704 = vmatmul.mubr.msk.f32.vlgmr.msra.gmra.mrb[4].mxu0 %vm1234_vm3, %v1727_v45  ;;  %v3832_v45 = vpack.c.bf16 %v1909_v44, %v1908_v32 }
 0x5fd   : > { %3719 = vmatprep.mubr.msk.f32.mxu0 %vm4696_vm2, %v4697_v26 }
 0x5fe   : > { %3833 = vmatpush3.bf16.msra.mxu0 %v3832_v45 }
 0x5ff   : > { %3834 = vmatprep.subr.bf16.mxu0 %v4695_v23 }
 0x6be   : > { %v1305_v46 = vpop.f32.mrb[2].mxu1 }
 0x6bf   : > { %v3675_v47 = vpop.f32.mrb[3].mxu1  ;;  %v1309_v48 = vsel %vm1234_vm3, %v1305_v46, -inf }
 0x6c0   : > { %1310 = vmax.xlane.f32.xlu1 %v1309_v48  ;;  %v1910_v48 = vld [vmem:[%s5485_s0 + $0x10] sm:$0xff] }
 0x6c2   : > { %v1470_v49 = vpop.f32.mrb[0].mxu0 }
 0x6c3   : > { %v3685_v50 = vpop.f32.mrb[1].mxu0  ;;  %v1474_v51 = vsel %vm1234_vm3, %v1470_v49, -inf }
 0x6c4   : > { %1475 = vmax.xlane.f32.xlu0 %v1474_v51 }
 0x6c7   : > { %v1635_v52 = vpop.f32.mrb[2].mxu0 }
 0x6c8   : > { %v3695_v53 = vpop.f32.mrb[3].mxu0  ;;  %v1639_v54 = vsel %vm1234_vm3, %v1635_v52, -inf }
 0x6c9   : > { %1640 = vmax.xlane.f32.xlu1 %v1639_v54 }
 0x6cf   : > { %v1800_v55 = vpop.f32.mrb[4].mxu0 }
 0x6d0   : > { %v3705_v56 = vpop.f32.mrb[5].mxu0  ;;  %v1804_v57 = vsel %vm1234_vm3, %v1800_v55, -inf }
 0x6d1   : > { %1805 = vmax.xlane.f32.xlu0 %v1804_v57 }
 0x6da   : > { %1320 = vrot.lane.b32.xlu1 %v5544_v37, %s4705_s12  ;;  %s4706_s12 = smov 48  }
 0x74d   : > { %v1311_v58 = vpop.xlane.xlu1 %1310 }
 0x74e   : > { %v1312_v59 = vsub.f32 %v1305_v46, %v1311_v58 }
 0x750   : > { %v1313_v60 = vmul.f32 1.442695, %v1312_v59  ;;  %v2073_v59 = vld [vmem:[%s5490_s4] sm:$0xff] }
 0x751   : > { %v1476_v61 = vpop.xlane.xlu0 %1475 }
 0x752   : > { %4034 = vpow2.f32 %v1313_v60  ;;  %v1477_v62 = vsub.f32 %v1470_v49, %v1476_v61  ;;  %v1911_v49 = vld [vmem:[%s5485_s0 + $0x18] sm:$0xff]  ;;  %s5947_s0 = smov 104   ;;  %v2074_v60 = vld [vmem:[%s5490_s4 + $0x8] sm:$0xff] }
 0x753   : > { %v3835_v50 = vpack.c.bf16 %v1911_v49, %v1910_v48 }
 0x754   : > { %v1478_v63 = vmul.f32 1.442695, %v1477_v62 }
 0x755   : > { %3836 = vmatpush3.bf16.msra.mxu0 %v3835_v50 }
 0x756   : > { %4036 = vpow2.f32 %v1478_v63  ;;  %v1641_v0 = vpop.xlane.xlu1 %1640  ;;  %3843 = vmatprep.subr.bf16.mxu0 %v4695_v23  ;;  %v3844_v63 = vpack.c.bf16 %v2074_v60, %v2073_v59 }
 0x757   : > { %v1642_v1 = vsub.f32 %v1635_v52, %v1641_v0 }
 0x759   : > { %v1643_v2 = vmul.f32 1.442695, %v1642_v1 }
 0x75a   : > { %v1321_v3 = vpop.permute.xlu1 %1320 }
 0x75b   : > { %4038 = vpow2.f32 %v1643_v2  ;;  %3677 = vmatpush3.msra.mxu1 %v1321_v3  ;;  %v2075_v2 = vld [vmem:[%s5490_s4 + $0x10] sm:$0xff]  ;;  %v2076_v3 = vld [vmem:[%s5490_s4 + $0x18] sm:$0xff]  ;;  %s5950_s4 = scalar_lea.vmem [#allocation3], %s5459_s19  ;;  %s5951_s19 = scalar_lea.vmem [#allocation10], %s5471_s17 }
 0x75c   : > { %v4035_v4 = vpop.eup %4034  ;;  %3686 = vmatprep.subr.mxu1 %v4697_v26 }
 0x75d   : > { %v1315_v5 = vsel %vm1234_vm3, %v4035_v4, 0.0 }
 0x75e   : > { %v1806_v6 = vpop.xlane.xlu0 %1805  ;;  %1316 = vadd.xlane.f32.xlu1 %v1315_v5  ;;  %v3847_v5 = vpack.c.bf16 %v2076_v3, %v2075_v2 }
 0x75f   : > { %v1807_v7 = vsub.f32 %v1800_v55, %v1806_v6 }
 0x760   : > { %v4037_v8 = vpop.eup %4036 }
 0x761   : > { %v1808_v9 = vmul.f32 1.442695, %v1807_v7  ;;  %v1480_v10 = vsel %vm1234_vm3, %v4037_v8, 0.0 }
 0x762   : > { %1481 = vadd.xlane.f32.xlu0 %v1480_v10 }
 0x763   : > { %4040 = vpow2.f32 %v1808_v9 }
 0x765   : > { %v4039_v11 = vpop.eup %4038 }
 0x766   : > { %v1645_v12 = vsel %vm1234_vm3, %v4039_v11, 0.0 }
 0x767   : > { %1646 = vadd.xlane.f32.xlu1 %v1645_v12 }
 0x76d   : > { %v4041_v14 = vpop.eup %4040 }
 0x76e   : > { %v1810_v15 = vsel %vm1234_vm3, %v4041_v14, 0.0 }
 0x76f   : > { %1811 = vadd.xlane.f32.xlu0 %v1810_v15 }
 0x778   : > { %1650 = vrot.lane.b32.xlu1 %v5544_v37, %s4706_s12  ;;  %s3124_s12 = sshll.u32 %s5502_s24, 4  ;;  %s5754_s12 = int_to_ptr.vmem [resolvable:$true] %s3124_s12 }
 0x77c   : > { %1815 = vrot.lane.b32.xlu1 %v5544_v37, %s4707_s2  ;;  %s4710_s2 = smov 16  }
 0x785   : > { %1485 = vrot.lane.b32.xlu0 %v5544_v37, %s4708_s14  ;;  %v3838_v37 = vpack.c.bf16 %v1997_v31, %v1996_v30  ;;  %s4709_s14 = smov 8  }
 0x7eb   : > { %v1317_v16 = vpop.xlane.xlu1 %1316 }
 0x7ec   : > { %4042 = vrcp.f32 %v1317_v16 }
 0x7ef   : > { %v1482_v17 = vpop.xlane.xlu0 %1481 }
 0x7f0   : > { %4044 = vrcp.f32 %v1482_v17 }
 0x7f4   : > { %v1647_v18 = vpop.xlane.xlu1 %1646 }
 0x7f5   : > { %4046 = vrcp.f32 %v1647_v18 }
 0x7f6   : > { %v4043_v19 = vpop.eup %4042 }
 0x7f7   : > { %v1319_v20 = vmul.f32 %v4043_v19, %v4035_v4 }
 0x7f8   : > { %v1651_v25 = vpop.permute.xlu1 %1650 }
 0x7f9   : > { %3679 = vmatmul.mubr.msk.f32.vlgmr.msra.gmra.mrb[4].mxu1 %vm1234_vm3, %v1319_v20 }
 0x7fa   : > { %3688 = vmatprep.mubr.msk.f32.mxu1 %vm4696_vm2, %v4697_v26  ;;  %v4045_v22 = vpop.eup %4044 }
 0x7fb   : > { %v1484_v24 = vmul.f32 %v4045_v22, %v4037_v8 }
 0x7fc   : > { %v1812_v21 = vpop.xlane.xlu0 %1811  ;;  %v1816_v33 = vpop.permute.xlu1 %1815 }
 0x7fd   : > { %4048 = vrcp.f32 %v1812_v21 }
 0x7ff   : > { %v4047_v28 = vpop.eup %4046 }
 0x800   : > { %v1486_v27 = vpop.permute.xlu0 %1485  ;;  %v1649_v29 = vmul.f32 %v4047_v28, %v4039_v11 }
 0x801   : > { %3687 = vmatpush3.msra.mxu1 %v1486_v27 }
 0x802   : > { %3689 = vmatmul.mubr.msk.f32.vlgmr.msra.gmra.mrb[6].mxu1 %vm1234_vm3, %v1484_v24  ;;  %3696 = vmatprep.subr.mxu1 %v4697_v26 }
 0x803   : > { %3697 = vmatpush3.msra.mxu1 %v1651_v25  ;;  %3698 = vmatprep.mubr.msk.f32.mxu1 %vm4696_vm2, %v4697_v26 }
 0x804   : > { %3706 = vmatprep.subr.mxu1 %v4697_v26 }
 0x806   : > { %3699 = vmatmul.mubr.msk.f32.vlgmr.msra.gmra.mrb[8].mxu1 %vm1234_vm3, %v1649_v29 }
 0x807   : > { %v4049_v35 = vpop.eup %4048  ;;  %3707 = vmatpush3.msra.mxu1 %v1816_v33  ;;  %3708 = vmatprep.mubr.msk.f32.mxu1 %vm4696_vm2, %v4697_v26 }
 0x808   : > { %v1814_v38 = vmul.f32 %v4049_v35, %v4041_v14  ;;  %3837 = vmatprep.subr.bf16.mxu1 %v4695_v23 }
 0x80a   : > { %3709 = vmatmul.mubr.msk.f32.vlgmr.msra.gmra.mrb[10].mxu1 %vm1234_vm3, %v1814_v38 }
 0x80b   : > { %3839 = vmatpush3.bf16.msra.mxu1 %v3838_v37  ;;  %3730 = vmatprep.mubr.msk.f32.mxu1 %vm4696_vm2, %v4697_v26 }
 0x80c   : > { %3840 = vmatprep.subr.bf16.mxu1 %v4695_v23 }
 0x80f   : > { %3842 = vmatpush3.bf16.msra.mxu1 %v3841_v42 }
 0x810   : > { %3744 = vmatprep.subr.mxu1 %v4697_v26 }
 0x812   : > { %3731 = vmatmul.mubr.msk.f32.vlgmr.msra.gmra.mrb[12].mxu1 %vm1125_vm1, %v1995_v43 }
 0x813   : > { %3746 = vmatprep.mubr.msk.f32.mxu1 %vm4696_vm2, %v4697_v26 }
 0x8cc   : > { %v1392_v46 = vpop.f32.mrb[4].mxu1 }
 0x8cd   : > { %v3680_v47 = vpop.f32.mrb[5].mxu1 }
 0x8d5   : > { %v1557_v34 = vpop.f32.mrb[6].mxu1 }
 0x8d6   : > { %1892 = vrot.lane.b32.xlu0 %v1557_v34, %s4709_s14  ;;  %v3690_v51 = vpop.f32.mrb[7].mxu1 }
 0x8d9   : > { %v1722_v52 = vpop.f32.mrb[8].mxu1 }
 0x8da   : > { %1896 = vrot.lane.b32.xlu1 %v1722_v52, %s4710_s2  ;;  %v3700_v53 = vpop.f32.mrb[9].mxu1 }
 0x8dd   : > { %v1887_v54 = vpop.f32.mrb[10].mxu1 }
 0x8de   : > { %1900 = vrot.lane.b32.xlu0 %v1887_v54, %s4711_s23  ;;  %v3710_v55 = vpop.f32.mrb[11].mxu1 }
 0x8e5   : > { %v2069_v56 = vpop.f32.mrb[12].mxu1 }
 0x8e6   : > { %2151 = vrot.lane.b32.xlu1 %v2069_v56, %s4699_s29  ;;  %2313 = vrot.lane.b32.xlu0 %v2069_v56, %s4700_s20  ;;  %v3732_v57 = vpop.f32.mrb[13].mxu1  ;;  %s5955_s29 = sld [smem:[#allocation40_spill]]  ;;  %s5956_s20 = scalar_lea.vmem [#allocation22], %s5471_s17 }
 0x8ea   : > { %2311 = vrot.lane.b32.xlu1 %v2069_v56, %s4698_s27  ;;  %2479 = vrot.lane.b32.xlu0 %v2069_v56, %s4701_s25 }
 0x8ec   : > { %p5959_p4 = scmp.ne.s32.totalorder %s5955_s29, 0 }
 0x8ee   : > { %2477 = vrot.lane.b32.xlu1 %v2069_v56, %s4702_s30  ;;  %2644 = vrot.lane.b32.xlu0 %v2069_v56, %s4703_s7  ;;  %s5948_s7 = scalar_lea.vmem [#allocation14], %s5471_s17 }
 0x8ef   : > { %v3554_v7 = vld [vmem:[%s5948_s7] ss:$0 sm:$0xff]  ;;  %s4544_s7 = scalar_lea.vmem %s5754_s12, 128 }
 0x8f0   : > { %p4545_p3 = scmp.ne.s32.totalorder %s5754_s12, %s4544_s7 }
 0x8f2   : > { %2642 = vrot.lane.b32.xlu1 %v2069_v56, %s5947_s0  ;;  %p4546_p12 = pnand %p4545_p3, %p5959_p4 }
 0x8f4   : > { %p4547_p13 = pneg %p4546_p12 }
 0x948   : > { %v1893_v58 = vpop.permute.xlu0 %1892 }
 0x949   : > { %v1903_v62 = vsel %vm1234_vm3, %v1392_v46, %v1893_v58 }
 0x94c   : > { %v1897_v61 = vpop.permute.xlu1 %1896 }
 0x94d   : > { %v1905_v0 = vsel %vm1904_vm4, %v1903_v62, %v1897_v61 }
 0x950   : > { %v1901_v1 = vpop.permute.xlu0 %1900 }
 0x951   : > { %v1907_v4 = vsel %vm1906_vm5, %v1905_v0, %v1901_v1 }
 0x952   : > { %3720 = vmatmul.mubr.msk.f32.vlgmr.msra.gmra.mrb[6].mxu0 %vm1125_vm1, %v1907_v4 }
 0x953   : > { %3845 = vmatpush3.bf16.msra.mxu0 %v3844_v63  ;;  %3741 = vmatprep.mubr.msk.f32.mxu0 %vm4696_vm2, %v4697_v26 }
 0x954   : > { %3846 = vmatprep.subr.bf16.mxu0 %v4695_v23 }
 0x957   : > { %3848 = vmatpush3.bf16.msra.mxu0 %v3847_v5 }
 0x958   : > { %v2152_v6 = vpop.permute.xlu1 %2151  ;;  %3754 = vmatprep.subr.mxu0 %v4697_v26  ;;  %v2314_v9 = vpop.permute.xlu0 %2313 }
 0x959   : > { %3745 = vmatpush3.xpose.msk.msra.mxu1 %vm1234_vm3, %v2152_v6 }
 0x95a   : > { %3749 = vmatprep.subr.mxu1 %v4697_v26 }
 0x95c   : > { %3747 = vmatmul.mubr.msk.f32.vlgmr.msra.gmra.mrb[14].mxu1 %vm1234_vm3, %v2069_v56  ;;  %v2312_v14 = vpop.permute.xlu1 %2311  ;;  %v2480_v15 = vpop.permute.xlu0 %2479 }
 0x95d   : > { %3751 = vmatprep.mubr.msk.f32.mxu1 %vm4696_vm2, %v4697_v26 }
 0x960   : > { %v2478_v16 = vpop.permute.xlu1 %2477  ;;  %v2645_v19 = vpop.permute.xlu0 %2644 }
 0x964   : > { %v2643_v20 = vpop.permute.xlu1 %2642 }
 0xa25   : > { %v1988_v8 = vpop.f32.mrb[6].mxu0 }
 0xa26   : > { %v1989_v10 = vadd.f32 %v3554_v7, %v1988_v8  ;;  %v3721_v11 = vpop.f32.mrb[7].mxu0  ;;  %v2822_v7 = vld [vmem:[%s5492_s6] sm:$0xff]  ;;  %v2823_v8 = vld [vmem:[%s5492_s6 + $0x8] sm:$0xff] }
 0xa27   : > { %v2825_v11 = vld [vmem:[%s5492_s6 + $0x18] sm:$0xff] }
 0xa28   : > { %v1992_v12 = vadd.f32 %v1989_v10, %v5513_v13  ;;  %v2824_v10 = vld [vmem:[%s5492_s6 + $0x10] sm:$0xff]  ;;  %s5952_s6 = scalar_lea.vmem [#allocation11], %s5471_s17 }
 0xa2a   : > { %3742 = vmatmul.mubr.msk.f32.vlgmr.msra.gmra.mrb[8].mxu0 %vm1125_vm1, %v1992_v12  ;;  %v3853_v12 = vpack.c.bf16 %v2825_v11, %v2824_v10 }
 0xa2b   : > { %3755 = vmatpush3.xpose.msk.msra.mxu0 %vm1234_vm3, %v2314_v9  ;;  %3756 = vmatprep.mubr.msk.f32.mxu0 %vm4696_vm2, %v4697_v26  ;;  %v3850_v9 = vpack.c.bf16 %v2823_v8, %v2822_v7 }
 0xa2c   : > { %3764 = vmatprep.subr.mxu0 %v4697_v26 }
 0xa2e   : > { %3757 = vmatmul.mubr.msk.f32.vlgmr.msra.gmra.mrb[10].mxu0 %vm1234_vm3, %v2312_v14 }
 0xa2f   : > { %v2223_v17 = vpop.f32.mrb[14].mxu1  ;;  %3765 = vmatpush3.xpose.msk.msra.mxu0 %vm1234_vm3, %v2480_v15  ;;  %3766 = vmatprep.mubr.msk.f32.mxu0 %vm4696_vm2, %v4697_v26 }
 0xa30   : > { %v2227_v13 = vsel %vm1234_vm3, %v2223_v17, -inf  ;;  %3774 = vmatprep.subr.mxu0 %v4697_v26  ;;  %v3748_v18 = vpop.f32.mrb[15].mxu1 }
 0xa31   : > { %2228 = vmax.xlane.f32.xlu0 %v2227_v13 }
 0xa32   : > { %3767 = vmatmul.mubr.msk.f32.vlgmr.msra.gmra.mrb[12].mxu0 %vm1234_vm3, %v2478_v16 }
 0xa33   : > { %3775 = vmatpush3.xpose.msk.msra.mxu0 %vm1234_vm3, %v2645_v19  ;;  %3776 = vmatprep.mubr.msk.f32.mxu0 %vm4696_vm2, %v4697_v26 }
 0xa34   : > { %3849 = vmatprep.subr.bf16.mxu0 %v4695_v23 }
 0xa36   : > { %3777 = vmatmul.mubr.msk.f32.vlgmr.msra.gmra.mrb[14].mxu0 %vm1234_vm3, %v2643_v20 }
 0xa37   : > { %3792 = vmatprep.mubr.msk.f32.mxu0 %vm4696_vm2, %v4697_v26  ;;  %3851 = vmatpush3.bf16.msra.mxu0 %v3850_v9 }
 0xa38   : > { %3852 = vmatprep.subr.bf16.mxu0 %v4695_v23 }
 0xa3b   : > { %3854 = vmatpush3.bf16.msra.mxu0 %v3853_v12 }
 0xa3c   : > { %3861 = vmatprep.subr.bf16.mxu0 %v4695_v23 }
 0xabe   : > { %v2229_v21 = vpop.xlane.xlu0 %2228 }
 0xabf   : > { %v2230_v22 = vsub.f32 %v2223_v17, %v2229_v21 }
 0xac1   : > { %v2231_v24 = vmul.f32 1.442695, %v2230_v22 }
 0xac3   : > { %4050 = vpow2.f32 %v2231_v24 }
 0xacd   : > { %v4051_v31 = vpop.eup %4050 }
 0xace   : > { %v2233_v37 = vsel %vm1234_vm3, %v4051_v31, 0.0 }
 0xafd   : > { %v2146_v25 = vpop.f32.mrb[8].mxu0 }
 0xafe   : > { %v3743_v27 = vpop.f32.mrb[9].mxu0  ;;  %3750 = vmatpush3.msra.mxu1 %v2146_v25 }
 0xaff   : > { %3759 = vmatprep.subr.mxu1 %v4697_v26 }
 0xb01   : > { %v2385_v28 = vpop.f32.mrb[10].mxu0 }
 0xb02   : > { %v3758_v29 = vpop.f32.mrb[11].mxu0  ;;  %v2389_v30 = vsel %vm1234_vm3, %v2385_v28, -inf }
 0xb03   : > { %2390 = vmax.xlane.f32.xlu1 %v2389_v30 }
 0xb05   : > { %v2551_v33 = vpop.f32.mrb[12].mxu0 }
 0xb06   : > { %v3768_v35 = vpop.f32.mrb[13].mxu0  ;;  %v2555_v36 = vsel %vm1234_vm3, %v2551_v33, -inf }
 0xb07   : > { %2556 = vmax.xlane.f32.xlu0 %v2555_v36  ;;  %2234 = vadd.xlane.f32.xlu1 %v2233_v37 }
 0xb09   : > { %v2716_v38 = vpop.f32.mrb[14].mxu0 }
 0xb0a   : > { %v3778_v39 = vpop.f32.mrb[15].mxu0  ;;  %v2720_v40 = vsel %vm1234_vm3, %v2716_v38, -inf }
 0xb0b   : > { %2721 = vmax.xlane.f32.xlu0 %v2720_v40  ;;  %v2934_v40 = vld [vmem:[%s5495_s22] sm:$0xff] }
 0xb18   : > { %2401 = vrot.lane.b32.xlu1 %v2146_v25, %s4698_s27  ;;  %s5954_s27 = scalar_lea.vmem [#allocation20], %s5471_s17 }
 0xb90   : > { %v2391_v41 = vpop.xlane.xlu1 %2390 }
 0xb91   : > { %v2392_v42 = vsub.f32 %v2385_v28, %v2391_v41  ;;  %v1123_v28 = vld [vmem:[%s5950_s4] sm:$0xff] }
 0xb92   : > { %v2935_v41 = vld [vmem:[%s5495_s22 + $0x8] sm:$0xff] }
 0xb93   : > { %v2393_v43 = vmul.f32 1.442695, %v2392_v42  ;;  %v3856_v42 = vpack.c.bf16 %v2935_v41, %v2934_v40 }
 0xb94   : > { %v2235_v32 = vpop.xlane.xlu1 %2234  ;;  %v2557_v44 = vpop.xlane.xlu0 %2556 }
 0xb95   : > { %4052 = vpow2.f32 %v2393_v43  ;;  %v2558_v45 = vsub.f32 %v2551_v33, %v2557_v44  ;;  %v2936_v43 = vld [vmem:[%s5495_s22 + $0x10] sm:$0xff] }
 0xb96   : > { %4054 = vrcp.f32 %v2235_v32  ;;  %v2937_v32 = vld [vmem:[%s5495_s22 + $0x18] sm:$0xff]  ;;  %s5953_s22 = sld [smem:[#allocation32_spill]] }
 0xb97   : > { %v2559_v46 = vmul.f32 1.442695, %v2558_v45  ;;  %v3859_v44 = vpack.c.bf16 %v2937_v32, %v2936_v43  ;;  %v3019_v45 = vld [vmem:[%s5498_s13] sm:$0xff] }
 0xb98   : > { %v2722_v47 = vpop.xlane.xlu0 %2721  ;;  %v2402_v54 = vpop.permute.xlu1 %2401 }
 0xb99   : > { %4056 = vpow2.f32 %v2559_v46  ;;  %v2723_v48 = vsub.f32 %v2716_v38, %v2722_v47  ;;  %v3020_v46 = vld [vmem:[%s5498_s13 + $0x8] sm:$0xff]  ;;  %v3021_v47 = vld [vmem:[%s5498_s13 + $0x10] sm:$0xff] }
 0xb9b   : > { %v2724_v49 = vmul.f32 1.442695, %v2723_v48  ;;  %v3862_v48 = vpack.c.bf16 %v3020_v46, %v3019_v45 }
 0xb9c   : > { %s3579_s25 = sshll.u32 %s5953_s22, 7 }
 0xb9d   : > { %4058 = vpow2.f32 %v2724_v49  ;;  %v3022_v49 = vld [vmem:[%s5498_s13 + $0x18] sm:$0xff] }
 0xb9f   : > { %v4053_v50 = vpop.eup %4052 }
 0xba0   : > { %v4055_v34 = vpop.eup %4054  ;;  %v2395_v51 = vsel %vm1234_vm3, %v4053_v50, 0.0 }
 0xba1   : > { %v2237_v52 = vmul.f32 %v4055_v34, %v4051_v31  ;;  %2396 = vadd.xlane.f32.xlu0 %v2395_v51  ;;  %v3023_v34 = vld [vmem:[%s5498_s13 + $0x20] sm:$0xff]  ;;  %v3024_v51 = vld [vmem:[%s5498_s13 + $0x28] sm:$0xff] }
 0xba3   : > { %v4057_v53 = vpop.eup %4056  ;;  %3752 = vmatmul.mubr.msk.f32.vlgmr.msra.gmra.mrb[16].mxu1 %vm1234_vm3, %v2237_v52  ;;  %v3868_v52 = vpack.c.bf16 %v3024_v51, %v3023_v34 }
 0xba4   : > { %3760 = vmatpush3.msra.mxu1 %v2402_v54  ;;  %v2561_v55 = vsel %vm1234_vm3, %v4057_v53, 0.0  ;;  %3761 = vmatprep.mubr.msk.f32.mxu1 %vm4696_vm2, %v4697_v26 }
 0xba5   : > { %2562 = vadd.xlane.f32.xlu1 %v2561_v55  ;;  %3769 = vmatprep.subr.mxu1 %v4697_v26 }
 0xba7   : > { %v4059_v56 = vpop.eup %4058 }
 0xba8   : > { %v2726_v57 = vsel %vm1234_vm3, %v4059_v56, 0.0 }
 0xba9   : > { %2727 = vadd.xlane.f32.xlu0 %v2726_v57  ;;  %v3572_v57 = vld [vmem:[%s5951_s19] ss:$0 sm:$0xff] }
 0xbb6   : > { %2731 = vrot.lane.b32.xlu1 %v2146_v25, %s5947_s0 }
 0xbbf   : > { %2566 = vrot.lane.b32.xlu0 %v2146_v25, %s4702_s30  ;;  %s5949_s30 = scalar_lea.vmem [#allocation18], %s5471_s17  ;;  %s5958_s17 = sand.u32 1, %s4650_s28  }
 0xbc0   : > { %v3570_v27 = vld [vmem:[%s5949_s30] ss:$0 sm:$0xff]  ;;  %s3111_s0 = scalar_lea.sflag [#allocation5], %s5958_s17  ;;  %s4712_s30 = smov [#allocation23]  }
 0xbc1   : > { %s4548_s4 = sshll.u32 %s4712_s30, 4  ;;  %s4549_s4 = int_to_ptr.vmem [resolvable:$false] %s4548_s4 }
 0xbc2   : > { %s4550_s19 = scalar_lea.vmem %s4549_s4, 256  ;;  %p4551_p5 = scmp.lt.s32.totalorder %s5754_s12, %s4549_s4 }
 0xbc3   : > { %p4552_p7 = scmp.lt.s32.totalorder %s4550_s19, %s4544_s7 }
 0xbc5   : > { %p4553_p6 = por %p4552_p7, %p4551_p5 }
 0xbc7   : > { %p4554_p0 = pnand %p4553_p6, %p4547_p13 }
 0xc2e   : > { %v2397_v58 = vpop.xlane.xlu0 %2396 }
 0xc2f   : > { %4060 = vrcp.f32 %v2397_v58 }
 0xc32   : > { %v2563_v59 = vpop.xlane.xlu1 %2562 }
 0xc33   : > { %4062 = vrcp.f32 %v2563_v59  ;;  %v3573_v59 = vld [vmem:[%s5952_s6] ss:$0 sm:$0xff] }
 0xc36   : > { %v2728_v60 = vpop.xlane.xlu0 %2727  ;;  %v2732_v2 = vpop.permute.xlu1 %2731 }
 0xc37   : > { %4064 = vrcp.f32 %v2728_v60 }
 0xc39   : > { %v4061_v61 = vpop.eup %4060 }
 0xc3a   : > { %v2399_v62 = vmul.f32 %v4061_v61, %v4053_v50  ;;  %v2567_v63 = vpop.permute.xlu0 %2566  ;;  %v3865_v50 = vpack.c.bf16 %v3022_v49, %v3021_v47 }
 0xc3c   : > { %3762 = vmatmul.mubr.msk.f32.vlgmr.msra.gmra.mrb[18].mxu1 %vm1234_vm3, %v2399_v62  ;;  %v3025_v62 = vld [vmem:[%s5498_s13 + $0x30] sm:$0xff] }
 0xc3d   : > { %v4063_v0 = vpop.eup %4062  ;;  %3770 = vmatpush3.msra.mxu1 %v2567_v63  ;;  %3771 = vmatprep.mubr.msk.f32.mxu1 %vm4696_vm2, %v4697_v26 }
 0xc3e   : > { %v2565_v1 = vmul.f32 %v4063_v0, %v4057_v53  ;;  %3779 = vmatprep.subr.mxu1 %v4697_v26  ;;  %v3574_v0 = vld [vmem:[%s5954_s27] ss:$0 sm:$0xff] }
 0xc40   : > { %3772 = vmatmul.mubr.msk.f32.vlgmr.msra.gmra.mrb[20].mxu1 %vm1234_vm3, %v2565_v1 }
 0xc41   : > { %v4065_v3 = vpop.eup %4064  ;;  %3780 = vmatpush3.msra.mxu1 %v2732_v2  ;;  %3781 = vmatprep.mubr.msk.f32.mxu1 %vm4696_vm2, %v4697_v26 }
 0xc42   : > { %v2730_v4 = vmul.f32 %v4065_v3, %v4059_v56  ;;  %3855 = vmatprep.subr.bf16.mxu1 %v4695_v23 }
 0xc44   : > { %3782 = vmatmul.mubr.msk.f32.vlgmr.msra.gmra.mrb[22].mxu1 %vm1234_vm3, %v2730_v4 }
 0xc45   : > { %3803 = vmatprep.mubr.msk.f32.mxu1 %vm4696_vm2, %v4697_v26  ;;  %3857 = vmatpush3.bf16.msra.mxu1 %v3856_v42 }
 0xc46   : > { %3858 = vmatprep.subr.bf16.mxu1 %v4695_v23 }
 0xc49   : > { %3860 = vmatpush3.bf16.msra.mxu1 %v3859_v44 }
 0xc76   : > { %v2307_v5 = vpop.f32.mrb[16].mxu1 }
 0xc77   : > { %v3753_v6 = vpop.f32.mrb[17].mxu1 }
 0xd0f   : > { %v2473_v14 = vpop.f32.mrb[18].mxu1 }
 0xd10   : > { %2808 = vrot.lane.b32.xlu1 %v2473_v14, %s4709_s14  ;;  %v3763_v15 = vpop.f32.mrb[19].mxu1 }
 0xd13   : > { %v2638_v16 = vpop.f32.mrb[20].mxu1 }
 0xd14   : > { %2812 = vrot.lane.b32.xlu0 %v2638_v16, %s4710_s2  ;;  %v3773_v17 = vpop.f32.mrb[21].mxu1  ;;  %s5957_s2 = sld [smem:[#allocation56_spill]] }
 0xd17   : > { %v2803_v13 = vpop.f32.mrb[22].mxu1 }
 0xd18   : > { %2816 = vrot.lane.b32.xlu1 %v2803_v13, %s4711_s23  ;;  %v3783_v18 = vpop.f32.mrb[23].mxu1 }
 0xd1a   : > { %s5752_s23 = scalar_lea.hbm %s5957_s2, %s3579_s25 }
 0xd82   : > { %v2809_v19 = vpop.permute.xlu1 %2808 }
 0xd83   : > { %v2819_v21 = vsel %vm1234_vm3, %v2307_v5, %v2809_v19  ;;  %v3576_v5 = vld [vmem:[%s5956_s20] ss:$0 sm:$0xff] }
 0xd86   : > { %v2813_v20 = vpop.permute.xlu0 %2812 }
 0xd87   : > { %v2820_v22 = vsel %vm1904_vm4, %v2819_v21, %v2813_v20 }
 0xd8a   : > { %v2817_v24 = vpop.permute.xlu1 %2816 }
 0xd8b   : > { %v2821_v25 = vsel %vm1906_vm5, %v2820_v22, %v2817_v24 }
 0xd8c   : > { %3793 = vmatmul.mubr.msk.f32.vlgmr.msra.gmra.mrb[16].mxu0 %vm1125_vm1, %v2821_v25 }
 0xd8d   : > { %3822 = vmatprep.mubr.msk.f32.mxu0 %vm4696_vm2, %v4697_v26  ;;  %3863 = vmatpush3.bf16.msra.mxu0 %v3862_v48 }
 0xd8e   : > { %3864 = vmatprep.subr.bf16.mxu0 %v4695_v23 }
 0xd91   : > { %3866 = vmatpush3.bf16.msra.mxu0 %v3865_v50 }
 0xd92   : > { %3867 = vmatprep.subr.bf16.mxu0 %v4695_v23 }
 0xd95   : > { %3869 = vmatpush3.bf16.msra.mxu0 %v3868_v52 }
 0xd96   : > { %3870 = vmatprep.subr.bf16.mxu0 %v4695_v23  ;;  %v3026_v23 = vld [vmem:[%s5498_s13 + $0x38] sm:$0xff] }
 0xd97   : > { %v3871_v63 = vpack.c.bf16 %v3026_v23, %v3025_v62 }
 0xd99   : > { %3872 = vmatpush3.bf16.msra.mxu0 %v3871_v63 }
 0xe5f   : > { %v2902_v29 = vpop.f32.mrb[16].mxu0 }
 0xe60   : > { %v2903_v30 = vadd.f32 %v3570_v27, %v2902_v29  ;;  %v3794_v31 = vpop.f32.mrb[17].mxu0 }
 0xe62   : > { %v2906_v33 = vadd.f32 %v2903_v30, %v1123_v28 }
 0xe64   : > { %v2907_v35 = vsel %vm1125_vm1, %v2906_v33, 0.0 }
 0xe65   : > { %2908 = vadd.xlane.f32.xlu0 %v2907_v35 }
 0xef2   : > { %v2909_v36 = vpop.xlane.xlu0 %2908 }
 0xef3   : > { %v2910_v37 = vmul.f32 0.03125, %v2909_v36 }
 0xef5   : > { %v2911_v26 = vsub.f32 %v2906_v33, %v2910_v37 }
 0xef7   : > { %v2912_v38 = vmul.f32 %v2911_v26, %v2911_v26 }
 0xef9   : > { %v2913_v39 = vsel %vm1125_vm1, %v2912_v38, 0.0 }
 0xefa   : > { %2914 = vadd.xlane.f32.xlu1 %v2913_v39 }
 0xf87   : > { %v2915_v53 = vpop.xlane.xlu1 %2914 }
 0xf88   : > { %v2916_v54 = vmul.f32 0.03125, %v2915_v53 }
 0xf8a   : > { %v2917_v55 = vadd.f32 1e-05, %v2916_v54 }
 0xf8c   : > { %4066 = vrsqrt.f32 %v2917_v55 }
 0xf96   : > { %v4067_v56 = vpop.eup %4066 }
 0xf97   : > { %v2919_v58 = vmul.f32 %v4067_v56, %v2911_v26 }
 0xf99   : > { %v2926_v60 = vmul.f32 %v3572_v57, %v2919_v58 }
 0xf9b   : > { %v2933_v61 = vadd.f32 %v3573_v59, %v2926_v60 }
 0xf9d   : > { %3804 = vmatmul.mubr.msk.f32.vlgmr.msra.gmra.mrb[24].mxu1 %vm1125_vm1, %v2933_v61 }
0x1070   : > { %v3014_v1 = vpop.f32.mrb[24].mxu1 }
0x1071   : > { %v3015_v2 = vadd.f32 %v3574_v0, %v3014_v1  ;;  %v3805_v3 = vpop.f32.mrb[25].mxu1 }
0x1073   : > { %v3018_v4 = vmax.f32 %v3015_v2, 0.0 }
0x1075   : > { %3823 = vmatmul.mubr.msk.f32.vlgmr.msra.gmra.mrb[18].mxu0 %vm3034_vm6, %v3018_v4 }
0x1148   : > { %v3104_v6 = vpop.f32.mrb[18].mxu0 }
0x1149   : > { %v3105_v7 = vadd.f32 %v3576_v5, %v3104_v6  ;;  %v3824_v8 = vpop.f32.mrb[19].mxu0 }
0x114b   : > { %v3108_v9 = vadd.f32 %v3105_v7, %v2906_v33 }
0x114d   : > { %3109 = vst.msk [vmem:[%s5502_s24] sm:$0xff] %vm1125_vm1, %v3108_v9 }
0x114e   : > { %4557 = shalt.err (!%p4554_p0)
}
0x114f   : > { %s4558_s24 = scalar_lea.hbm %s5752_s23, 128  ;;  %s4562_s27 = scalar_lea.hbm %s5957_s2, 256 }
0x1150   : > { %p4559_p11 = scmp.ne.s32.totalorder %s5752_s23, %s4558_s24  ;;  %p4563_p8 = scmp.lt.u32.totalorder %s5752_s23, %s5957_s2 }
0x1151   : > { %p4564_p10 = scmp.lt.u32.totalorder %s4562_s27, %s4558_s24  ;;  %p4566_p3 = scmp.lt.u32.totalorder %s4558_s24, %s5752_s23 }
0x1152   : > { %p4560_p1 = pnand %p4559_p11, %p5959_p4 }
0x1153   : > { %p4565_p9 = por %p4564_p10, %p4563_p8 }
0x1154   : > { %p4561_p2 = pneg %p4560_p1 }
0x1155   : > { %p4567_p12 = por %p4566_p3, %p4565_p9 }
0x1157   : > { %p4568_p13 = pnand %p4567_p12, %p4561_p2 }
0x1159   : > { %4571 = shalt.err (!%p4568_p13)
}
0x115a   : > { %3909 = dma.vmem_to_hbm [thread:$0]  (%p5959_p4), %s5754_s12, 128, %s5752_s23, %s3111_s0  }
0x115b PF: > { %s5960_s13 = sld [smem:[#allocation29_spill]]  ;;  %s5961_s14 = sld [smem:[#allocation41_spill]] }
0x115c   : > { %p3921_p5 = scmp.ge.s32.totalorder %s4674_s1, 2 }
0x1161   : > { %s3136_s17 = sand.u32 1, %s5960_s13   ;;  %p5962_p7 = scmp.ne.s32.totalorder %s5961_s14, 0 }
0x1162   : > { %s3137_s7 = scalar_lea.sflag [#allocation5], %s3136_s17 }
0x1163   : > { %p3916_p6 = pnand %p3921_p5, %p5962_p7 }
0x1165   : > { %4629 = dma.done.wait (!%p3916_p6), %s3137_s7, 128  }
0x1166   : > { %4631 = vsyncadd (!%p3916_p6), %s3137_s7, 4294967168  ;;  %s34_s1 = sadd.s32 1, %s4674_s1   ;;  %s5963_s24 = sld [smem:[#allocation28_spill]] }
0x1167   : > { %p31_p0 = scmp.ge.s32.totalorder %s34_s1, 6   ;;  %s5964_s29 = sld [smem:[#allocation37_spill]] }
0x1168   : > { %s5965_s30 = sld [smem:[#allocation30_spill]]  ;;  %s5966_s12 = sld [smem:[#allocation38_spill]] }
0x1169   : > { %s5967_s23 = sld [smem:[#allocation33_spill]]  ;;  %s5968_s4 = sld [smem:[#allocation34_spill]] }
0x116a   : > { %s5969_s19 = sld [smem:[#allocation35_spill]]  ;;  %s5970_s25 = smov %s4642_s26 }
0x116b   : > { %s5972_s27 = smov %s4650_s28  ;;  %s5975_s0 = smov %s4666_s18 }
0x116c   :  { %33 = sbr.rel (!%p31_p0) target bundleno = 26 (0x1a), region = 306 }
0x116d   : > { %s5971_s26 = smov %s5964_s29 }
0x116e   : > { %s5973_s28 = smov %s5965_s30  ;;  %s5974_s29 = smov %s5966_s12 }
0x116f   : > { %s5976_s30 = smov %s5967_s23  ;;  %s5977_s18 = smov %s5968_s4 }
0x1173   :  { %3142 = vsyncpa [#allocation4], 1 }
0x1174   :  { %3144 = vsyncpa [#allocation4 + $0x1], 1 }
0x1175   :  { %3145 = vsyncpa [#allocation7], 1 }
0x1176   :  { %3146 = vsyncpa [#allocation5], 1 }
0x1177   :  { %3148 = vsyncpa [#allocation5 + $0x1], 1 }

</bundles_post_ra>
